<compile_context>
chip_gen: v5e
topology: v5e:2x2
jax: 0.10.0
libtpu: 0.0.40
codegen_flags: <defaults>
</compile_context>

<pallas_src>
import functools

import numpy as np

import jax
import jax.numpy as jnp
from jax import lax
from jax.experimental import pallas as pl
from jax.experimental.pallas import tpu as pltpu


_EPS = 1e-5
_MARGIN = 8  # lanes of zero slack on each side of the flat frame (>= 1 needed)


def _residual_block_kernel(x_ref, w1_ref, g1_ref, b1_ref, w2_ref, g2_ref, b2_ref,
                           mask_l_ref, mask_r_ref, valid_ref,
                           o_ref, frame_ref, patch_ref,
                           *, n_batch, height, width):
    """Fused residualBlock forward (channels in sublanes, flattened pixels in lanes).

    x_ref:     (N, C, H*W)  input, NCHW with spatial dims flattened (lane-dense)
    w*_ref:    (C, 9*C)     conv weights, rows=co, cols ordered (kh, kw, ci)
    g*/b*_ref: (C, 1)       BatchNorm gamma / beta
    mask_*:    (1, SLAB)    column masks (dw=-1 / dw=+1 taps) and validity mask
    o_ref:     (N, C, H*W)  output (lane-dense)
    frame_ref: (C, FRAME)   zero-padded flat working frame       (VMEM scratch)
    patch_ref: (9*C, SLAB)  im2col matrix for the 3x3 conv       (VMEM scratch)
    """
    N, H, W = n_batch, height, width
    C = x_ref.shape[1]
    HW = H * W
    f32 = jnp.float32

    ROWS = N * (H + 1) + 1          # image rows + zero separator rows
    SLAB = (ROWS - 2) * W           # lanes the conv is evaluated over
    SLAB0 = _MARGIN + W             # frame-buffer offset of slab lane 0
    IMG_STRIDE = (H + 1) * W        # slab-lane stride between consecutive images
    inv_count = 1.0 / (N * HW)      # BN statistics divisor (valid pixels only)

    mask_l = mask_l_ref[...]        # 0 where output column w == 0     (dw = -1 taps)
    mask_r = mask_r_ref[...]        # 0 where output column w == W - 1 (dw = +1 taps)
    valid = valid_ref[...]          # 0 on inter-image separator rows

    # ---- build the zero-padded flat frame from the NCHW input (pad fused in) ----
    frame_ref[...] = jnp.zeros(frame_ref.shape, f32)
    for n in range(N):
        s = SLAB0 + n * IMG_STRIDE
        frame_ref[:, s:s + HW] = x_ref[n].astype(f32)

    def conv3x3(w_ref):
        # im2col: 9 lane-shifted views of the frame stacked along sublanes, then a
        # single (C, 9C) x (9C, SLAB) MXU matmul.
        for dh in (-1, 0, 1):
            for dw in (-1, 0, 1):
                r0 = ((dh + 1) * 3 + (dw + 1)) * C
                s0 = SLAB0 + dh * W + dw
                tap = frame_ref[:, s0:s0 + SLAB]
                if dw == -1:
                    tap = tap * mask_l
                elif dw == 1:
                    tap = tap * mask_r
                patch_ref[r0:r0 + C, :] = tap
        return jnp.dot(w_ref[...].astype(f32), patch_ref[...],
                       preferred_element_type=f32)

    def batchnorm(acc, g_ref, b_ref):
        # Training-mode BN fused to one scale+shift; one masked stats pass
        # (mean and E[x^2] together), biased variance as in PyTorch.
        am = acc * valid
        s1 = jnp.sum(am, axis=1, keepdims=True)
        s2 = jnp.sum(am * acc, axis=1, keepdims=True)
        mean = s1 * inv_count
        var = s2 * inv_count - mean * mean
        scale = g_ref[...].astype(f32) * lax.rsqrt(var + _EPS)
        shift = b_ref[...].astype(f32) - mean * scale
        return acc * scale + shift

    # block 1: conv -> BN -> ReLU.  Only the valid image regions are written back
    # into the frame; separator / pad lanes keep their initial zeros, so no
    # full-slab re-zeroing multiply is needed.
    h1 = jnp.maximum(batchnorm(conv3x3(w1_ref), g1_ref, b1_ref), 0.0)
    for n in range(N):
        s = n * IMG_STRIDE
        frame_ref[:, SLAB0 + s:SLAB0 + s + HW] = h1[:, s:s + HW]

    # block 2: conv -> BN (no ReLU before the residual add)
    y2 = batchnorm(conv3x3(w2_ref), g2_ref, b2_ref)

    # residual add + final ReLU, stored lane-dense (last dim = H*W)
    for n in range(N):
        s = n * IMG_STRIDE
        o_ref[n] = jnp.maximum(y2[:, s:s + HW] + x_ref[n].astype(f32),
                               0.0).astype(o_ref.dtype)


def residual_block_forward(x_nchw, params):
    """residualBlock.forward (downsample=None, stride=1).  Input/output are NCHW."""
    N, C, H, W = x_nchw.shape
    (w1, g1, b1), (w2, g2, b2) = params
    assert w1.shape == (C, C, 3, 3) and w2.shape == (C, C, 3, 3)

    HW = H * W
    ROWS = N * (H + 1) + 1
    SLAB = (ROWS - 2) * W
    FRAME = ROWS * W + 2 * _MARGIN

    # (co, ci, kh, kw) -> (co, (kh, kw, ci)) : matches the im2col row order.
    w1_mat = jnp.transpose(w1, (0, 2, 3, 1)).reshape(C, 9 * C)
    w2_mat = jnp.transpose(w2, (0, 2, 3, 1)).reshape(C, 9 * C)

    # Static masks for the flattened-frame conv / BN (built host-side, trace-time).
    col = np.arange(SLAB) % W
    row = np.arange(SLAB) // W
    mask_l = jnp.asarray((col != 0).astype(np.float32)[None, :])
    mask_r = jnp.asarray((col != W - 1).astype(np.float32)[None, :])
    valid = jnp.asarray((((row + 1) % (H + 1)) != 0).astype(np.float32)[None, :])

    kernel = functools.partial(_residual_block_kernel,
                               n_batch=N, height=H, width=W)
    out = pl.pallas_call(
        kernel,
        out_shape=jax.ShapeDtypeStruct((N, C, HW), jnp.float32),
        in_specs=[pl.BlockSpec(memory_space=pltpu.MemorySpace.VMEM)] * 10,
        out_specs=pl.BlockSpec(memory_space=pltpu.MemorySpace.VMEM),
        scratch_shapes=[
            pltpu.VMEM((C, FRAME), jnp.float32),      # padded flat frame
            pltpu.VMEM((9 * C, SLAB), jnp.float32),   # im2col matrix
        ],
    )(x_nchw.reshape(N, C, HW),
      w1_mat, g1.reshape(C, 1), b1.reshape(C, 1),
      w2_mat, g2.reshape(C, 1), b2.reshape(C, 1),
      mask_l, mask_r, valid)
    return out.reshape(N, C, H, W)


def init_residual_block_params(key, channels, ks=3):
    """Deterministic synthetic parameters (conv: kaiming-style; BN: near-default)."""
    params = []
    for _ in range(2):
        key, kw, kg, kb = jax.random.split(key, 4)
        fan_in = channels * ks * ks
        w = jax.random.normal(kw, (channels, channels, ks, ks), jnp.float32) * np.sqrt(
            2.0 / fan_in)                                          # OIHW, bias=False
        gamma = 1.0 + 0.1 * jax.random.normal(kg, (channels,), jnp.float32)
        beta = 0.1 * jax.random.normal(kb, (channels,), jnp.float32)
        params.append((w, gamma, beta))
    return params


def ref_forward(x, params):
    """Pure-JAX reference (lax.conv + training-mode BN) for correctness check."""
    (w1, g1, b1), (w2, g2, b2) = params

    def conv_bn(h, w, g, b, relu):
        y = lax.conv_general_dilated(
            h, w, window_strides=(1, 1), padding="SAME",
            dimension_numbers=("NCHW", "OIHW", "NCHW"))
        mean = jnp.mean(y, axis=(0, 2, 3), keepdims=True)
        var = jnp.mean((y - mean) ** 2, axis=(0, 2, 3), keepdims=True)
        y = (y - mean) * lax.rsqrt(var + _EPS)
        y = y * g.reshape(1, -1, 1, 1) + b.reshape(1, -1, 1, 1)
        return jnp.maximum(y, 0.0) if relu else y

    out = conv_bn(x, w1, g1, b1, relu=True)
    out = conv_bn(out, w2, g2, b2, relu=False)
    return jnp.maximum(out + x, 0.0)


if __name__ == "__main__":
    key = jax.random.PRNGKey(0)
    key, xk = jax.random.split(key)

    # residualBlock(in_channels=8, n_filters=8) -- identity residual needs Cin == Cout.
    N, C, H, W = 2, 8, 16, 16
    x = jax.random.normal(xk, (N, C, H, W), jnp.float32)
    params = init_residual_block_params(key, C)

    fwd = jax.jit(residual_block_forward)
    out = jax.block_until_ready(fwd(x, params))

    ref = ref_forward(x, params)
    assert out.shape == (N, C, H, W), out.shape
    err = float(jnp.max(jnp.abs(out - ref)))
    assert err < 2e-4, err

    print("KERNEL_OK")
</pallas_src>

<mosaic_0001>
module attributes {stable_mosaic.version = 11 : i64} {
  func.func @_residual_block_kernel(%arg0: memref<2x8x256xf32, #tpu.memory_space<vmem>>, %arg1: memref<8x72xf32, #tpu.memory_space<vmem>>, %arg2: memref<8x1xf32, #tpu.memory_space<vmem>>, %arg3: memref<8x1xf32, #tpu.memory_space<vmem>>, %arg4: memref<8x72xf32, #tpu.memory_space<vmem>>, %arg5: memref<8x1xf32, #tpu.memory_space<vmem>>, %arg6: memref<8x1xf32, #tpu.memory_space<vmem>>, %arg7: memref<1x528xf32, #tpu.memory_space<vmem>>, %arg8: memref<1x528xf32, #tpu.memory_space<vmem>>, %arg9: memref<1x528xf32, #tpu.memory_space<vmem>>, %arg10: memref<2x8x256xf32, #tpu.memory_space<vmem>>, %arg11: memref<8x576xf32, #tpu.memory_space<vmem>>, %arg12: memref<72x528xf32, #tpu.memory_space<vmem>>) attributes {dimension_semantics = [], scalar_prefetch = 0 : i64, scratch_operands = 2 : i64, tpu.core_type = #tpu.core_type<tc>} {
    %c0 = arith.constant 0 : index
    %c0_0 = arith.constant 0 : index
    %0 = vector.load %arg7[%c0, %c0_0] : memref<1x528xf32, #tpu.memory_space<vmem>>, vector<1x528xf32>
    %c0_1 = arith.constant 0 : index
    %c0_2 = arith.constant 0 : index
    %1 = vector.load %arg8[%c0_1, %c0_2] : memref<1x528xf32, #tpu.memory_space<vmem>>, vector<1x528xf32>
    %c0_3 = arith.constant 0 : index
    %c0_4 = arith.constant 0 : index
    %2 = vector.load %arg9[%c0_3, %c0_4] : memref<1x528xf32, #tpu.memory_space<vmem>>, vector<1x528xf32>
    %cst = arith.constant 0.000000e+00 : f32
    %3 = vector.broadcast %cst : f32 to vector<8x576xf32>
    %c0_5 = arith.constant 0 : index
    %c0_6 = arith.constant 0 : index
    %4 = vector.load %arg11[%c0_5, %c0_6] : memref<8x576xf32, #tpu.memory_space<vmem>>, vector<8x576xf32>
    tpu.vector_store %arg11[%c0_5, %c0_6], %3 {strides = array<i32>} : memref<8x576xf32, #tpu.memory_space<vmem>>, vector<8x576xf32>,
    %c0_7 = arith.constant 0 : index
    %c0_8 = arith.constant 0 : index
    %c0_9 = arith.constant 0 : index
    %5 = vector.load %arg0[%c0_7, %c0_8, %c0_9] : memref<2x8x256xf32, #tpu.memory_space<vmem>>, vector<1x8x256xf32>
    %6 = vector.shape_cast %5 : vector<1x8x256xf32> to vector<8x256xf32>
    %c0_10 = arith.constant 0 : index
    %c24 = arith.constant 24 : index
    %7 = vector.load %arg11[%c0_10, %c24] : memref<8x576xf32, #tpu.memory_space<vmem>>, vector<8x256xf32>
    tpu.vector_store %arg11[%c0_10, %c24], %6 {strides = array<i32>} : memref<8x576xf32, #tpu.memory_space<vmem>>, vector<8x256xf32>,
    %c1 = arith.constant 1 : index
    %c0_11 = arith.constant 0 : index
    %c0_12 = arith.constant 0 : index
    %8 = vector.load %arg0[%c1, %c0_11, %c0_12] : memref<2x8x256xf32, #tpu.memory_space<vmem>>, vector<1x8x256xf32>
    %9 = vector.shape_cast %8 : vector<1x8x256xf32> to vector<8x256xf32>
    %c0_13 = arith.constant 0 : index
    %c296 = arith.constant 296 : index
    %10 = vector.load %arg11[%c0_13, %c296] : memref<8x576xf32, #tpu.memory_space<vmem>>, vector<8x256xf32>
    tpu.vector_store %arg11[%c0_13, %c296], %9 {strides = array<i32>} : memref<8x576xf32, #tpu.memory_space<vmem>>, vector<8x256xf32>,
    %c0_14 = arith.constant 0 : index
    %c7 = arith.constant 7 : index
    %11 = vector.load %arg11[%c0_14, %c7] : memref<8x576xf32, #tpu.memory_space<vmem>>, vector<8x528xf32>
    %12 = vector.broadcast %0 : vector<1x528xf32> to vector<8x528xf32>
    %13 = arith.mulf %11, %12 : vector<8x528xf32>
    %c0_15 = arith.constant 0 : index
    %c0_16 = arith.constant 0 : index
    %14 = vector.load %arg12[%c0_15, %c0_16] : memref<72x528xf32, #tpu.memory_space<vmem>>, vector<8x528xf32>
    tpu.vector_store %arg12[%c0_15, %c0_16], %13 {strides = array<i32>} : memref<72x528xf32, #tpu.memory_space<vmem>>, vector<8x528xf32>,
    %c0_17 = arith.constant 0 : index
    %c8 = arith.constant 8 : index
    %15 = vector.load %arg11[%c0_17, %c8] : memref<8x576xf32, #tpu.memory_space<vmem>>, vector<8x528xf32>
    %c8_18 = arith.constant 8 : index
    %c0_19 = arith.constant 0 : index
    %16 = vector.load %arg12[%c8_18, %c0_19] : memref<72x528xf32, #tpu.memory_space<vmem>>, vector<8x528xf32>
    tpu.vector_store %arg12[%c8_18, %c0_19], %15 {strides = array<i32>} : memref<72x528xf32, #tpu.memory_space<vmem>>, vector<8x528xf32>,
    %c0_20 = arith.constant 0 : index
    %c9 = arith.constant 9 : index
    %17 = vector.load %arg11[%c0_20, %c9] : memref<8x576xf32, #tpu.memory_space<vmem>>, vector<8x528xf32>
    %18 = vector.broadcast %1 : vector<1x528xf32> to vector<8x528xf32>
    %19 = arith.mulf %17, %18 : vector<8x528xf32>
    %c16 = arith.constant 16 : index
    %c0_21 = arith.constant 0 : index
    %20 = vector.load %arg12[%c16, %c0_21] : memref<72x528xf32, #tpu.memory_space<vmem>>, vector<8x528xf32>
    tpu.vector_store %arg12[%c16, %c0_21], %19 {strides = array<i32>} : memref<72x528xf32, #tpu.memory_space<vmem>>, vector<8x528xf32>,
    %c0_22 = arith.constant 0 : index
    %c23 = arith.constant 23 : index
    %21 = vector.load %arg11[%c0_22, %c23] : memref<8x576xf32, #tpu.memory_space<vmem>>, vector<8x528xf32>
    %22 = vector.broadcast %0 : vector<1x528xf32> to vector<8x528xf32>
    %23 = arith.mulf %21, %22 : vector<8x528xf32>
    %c24_23 = arith.constant 24 : index
    %c0_24 = arith.constant 0 : index
    %24 = vector.load %arg12[%c24_23, %c0_24] : memref<72x528xf32, #tpu.memory_space<vmem>>, vector<8x528xf32>
    tpu.vector_store %arg12[%c24_23, %c0_24], %23 {strides = array<i32>} : memref<72x528xf32, #tpu.memory_space<vmem>>, vector<8x528xf32>,
    %c0_25 = arith.constant 0 : index
    %c24_26 = arith.constant 24 : index
    %25 = vector.load %arg11[%c0_25, %c24_26] : memref<8x576xf32, #tpu.memory_space<vmem>>, vector<8x528xf32>
    %c32 = arith.constant 32 : index
    %c0_27 = arith.constant 0 : index
    %26 = vector.load %arg12[%c32, %c0_27] : memref<72x528xf32, #tpu.memory_space<vmem>>, vector<8x528xf32>
    tpu.vector_store %arg12[%c32, %c0_27], %25 {strides = array<i32>} : memref<72x528xf32, #tpu.memory_space<vmem>>, vector<8x528xf32>,
    %c0_28 = arith.constant 0 : index
    %c25 = arith.constant 25 : index
    %27 = vector.load %arg11[%c0_28, %c25] : memref<8x576xf32, #tpu.memory_space<vmem>>, vector<8x528xf32>
    %28 = vector.broadcast %1 : vector<1x528xf32> to vector<8x528xf32>
    %29 = arith.mulf %27, %28 : vector<8x528xf32>
    %c40 = arith.constant 40 : index
    %c0_29 = arith.constant 0 : index
    %30 = vector.load %arg12[%c40, %c0_29] : memref<72x528xf32, #tpu.memory_space<vmem>>, vector<8x528xf32>
    tpu.vector_store %arg12[%c40, %c0_29], %29 {strides = array<i32>} : memref<72x528xf32, #tpu.memory_space<vmem>>, vector<8x528xf32>,
    %c0_30 = arith.constant 0 : index
    %c39 = arith.constant 39 : index
    %31 = vector.load %arg11[%c0_30, %c39] : memref<8x576xf32, #tpu.memory_space<vmem>>, vector<8x528xf32>
    %32 = vector.broadcast %0 : vector<1x528xf32> to vector<8x528xf32>
    %33 = arith.mulf %31, %32 : vector<8x528xf32>
    %c48 = arith.constant 48 : index
    %c0_31 = arith.constant 0 : index
    %34 = vector.load %arg12[%c48, %c0_31] : memref<72x528xf32, #tpu.memory_space<vmem>>, vector<8x528xf32>
    tpu.vector_store %arg12[%c48, %c0_31], %33 {strides = array<i32>} : memref<72x528xf32, #tpu.memory_space<vmem>>, vector<8x528xf32>,
    %c0_32 = arith.constant 0 : index
    %c40_33 = arith.constant 40 : index
    %35 = vector.load %arg11[%c0_32, %c40_33] : memref<8x576xf32, #tpu.memory_space<vmem>>, vector<8x528xf32>
    %c56 = arith.constant 56 : index
    %c0_34 = arith.constant 0 : index
    %36 = vector.load %arg12[%c56, %c0_34] : memref<72x528xf32, #tpu.memory_space<vmem>>, vector<8x528xf32>
    tpu.vector_store %arg12[%c56, %c0_34], %35 {strides = array<i32>} : memref<72x528xf32, #tpu.memory_space<vmem>>, vector<8x528xf32>,
    %c0_35 = arith.constant 0 : index
    %c41 = arith.constant 41 : index
    %37 = vector.load %arg11[%c0_35, %c41] : memref<8x576xf32, #tpu.memory_space<vmem>>, vector<8x528xf32>
    %38 = vector.broadcast %1 : vector<1x528xf32> to vector<8x528xf32>
    %39 = arith.mulf %37, %38 : vector<8x528xf32>
    %c64 = arith.constant 64 : index
    %c0_36 = arith.constant 0 : index
    %40 = vector.load %arg12[%c64, %c0_36] : memref<72x528xf32, #tpu.memory_space<vmem>>, vector<8x528xf32>
    tpu.vector_store %arg12[%c64, %c0_36], %39 {strides = array<i32>} : memref<72x528xf32, #tpu.memory_space<vmem>>, vector<8x528xf32>,
    %c0_37 = arith.constant 0 : index
    %c0_38 = arith.constant 0 : index
    %41 = vector.load %arg1[%c0_37, %c0_38] : memref<8x72xf32, #tpu.memory_space<vmem>>, vector<8x72xf32>
    %c0_39 = arith.constant 0 : index
    %c0_40 = arith.constant 0 : index
    %42 = vector.load %arg12[%c0_39, %c0_40] : memref<72x528xf32, #tpu.memory_space<vmem>>, vector<72x528xf32>
    %cst_41 = arith.constant dense<0.000000e+00> : vector<8x528xf32>
    %43 = tpu.matmul %41, %42, %cst_41 {dimension_numbers = #tpu.dot_dimension_numbers<[1], [0], [0], [1], [0, 0, 1, 1], [], []>} : vector<8x72xf32>, vector<72x528xf32>, vector<8x528xf32> -> vector<8x528xf32>
    %44 = vector.broadcast %2 : vector<1x528xf32> to vector<8x528xf32>
    %45 = arith.mulf %43, %44 : vector<8x528xf32>
    %cst_42 = arith.constant dense<0.000000e+00> : vector<8xf32>
    %46 = vector.multi_reduction <add>, %45, %cst_42 [1] : vector<8x528xf32> to vector<8xf32>
    %47 = vector.shape_cast %46 : vector<8xf32> to vector<8x1xf32>
    %48 = arith.mulf %45, %43 : vector<8x528xf32>
    %cst_43 = arith.constant dense<0.000000e+00> : vector<8xf32>
    %49 = vector.multi_reduction <add>, %48, %cst_43 [1] : vector<8x528xf32> to vector<8xf32>
    %50 = vector.shape_cast %49 : vector<8xf32> to vector<8x1xf32>
    %cst_44 = arith.constant 0.001953125 : f32
    %51 = vector.broadcast %cst_44 : f32 to vector<8x1xf32>
    %52 = arith.mulf %47, %51 : vector<8x1xf32>
    %cst_45 = arith.constant 0.001953125 : f32
    %53 = vector.broadcast %cst_45 : f32 to vector<8x1xf32>
    %54 = arith.mulf %50, %53 : vector<8x1xf32>
    %55 = arith.mulf %52, %52 : vector<8x1xf32>
    %56 = arith.subf %54, %55 : vector<8x1xf32>
    %c0_46 = arith.constant 0 : index
    %c0_47 = arith.constant 0 : index
    %57 = vector.load %arg2[%c0_46, %c0_47] : memref<8x1xf32, #tpu.memory_space<vmem>>, vector<8x1xf32>
    %cst_48 = arith.constant 9.99999974E-6 : f32
    %58 = vector.broadcast %cst_48 : f32 to vector<8x1xf32>
    %59 = arith.addf %56, %58 : vector<8x1xf32>
    %60 = math.rsqrt %59 : vector<8x1xf32>
    %61 = arith.mulf %57, %60 : vector<8x1xf32>
    %c0_49 = arith.constant 0 : index
    %c0_50 = arith.constant 0 : index
    %62 = vector.load %arg3[%c0_49, %c0_50] : memref<8x1xf32, #tpu.memory_space<vmem>>, vector<8x1xf32>
    %63 = arith.mulf %52, %61 : vector<8x1xf32>
    %64 = arith.subf %62, %63 : vector<8x1xf32>
    %65 = vector.broadcast %61 : vector<8x1xf32> to vector<8x528xf32>
    %66 = arith.mulf %43, %65 : vector<8x528xf32>
    %67 = vector.broadcast %64 : vector<8x1xf32> to vector<8x528xf32>
    %68 = arith.addf %66, %67 : vector<8x528xf32>
    %cst_51 = arith.constant 0.000000e+00 : f32
    %69 = vector.broadcast %cst_51 : f32 to vector<8x528xf32>
    %70 = arith.maximumf %68, %69 : vector<8x528xf32>
    %71 = vector.extract_strided_slice %70 {offsets = [0, 0], sizes = [8, 256], strides = [1, 1]} : vector<8x528xf32> to vector<8x256xf32>
    %c0_52 = arith.constant 0 : index
    %c24_53 = arith.constant 24 : index
    %72 = vector.load %arg11[%c0_52, %c24_53] : memref<8x576xf32, #tpu.memory_space<vmem>>, vector<8x256xf32>
    tpu.vector_store %arg11[%c0_52, %c24_53], %71 {strides = array<i32>} : memref<8x576xf32, #tpu.memory_space<vmem>>, vector<8x256xf32>,
    %73 = vector.extract_strided_slice %70 {offsets = [0, 272], sizes = [8, 256], strides = [1, 1]} : vector<8x528xf32> to vector<8x256xf32>
    %c0_54 = arith.constant 0 : index
    %c296_55 = arith.constant 296 : index
    %74 = vector.load %arg11[%c0_54, %c296_55] : memref<8x576xf32, #tpu.memory_space<vmem>>, vector<8x256xf32>
    tpu.vector_store %arg11[%c0_54, %c296_55], %73 {strides = array<i32>} : memref<8x576xf32, #tpu.memory_space<vmem>>, vector<8x256xf32>,
    %c0_56 = arith.constant 0 : index
    %c7_57 = arith.constant 7 : index
    %75 = vector.load %arg11[%c0_56, %c7_57] : memref<8x576xf32, #tpu.memory_space<vmem>>, vector<8x528xf32>
    %76 = vector.broadcast %0 : vector<1x528xf32> to vector<8x528xf32>
    %77 = arith.mulf %75, %76 : vector<8x528xf32>
    %c0_58 = arith.constant 0 : index
    %c0_59 = arith.constant 0 : index
    %78 = vector.load %arg12[%c0_58, %c0_59] : memref<72x528xf32, #tpu.memory_space<vmem>>, vector<8x528xf32>
    tpu.vector_store %arg12[%c0_58, %c0_59], %77 {strides = array<i32>} : memref<72x528xf32, #tpu.memory_space<vmem>>, vector<8x528xf32>,
    %c0_60 = arith.constant 0 : index
    %c8_61 = arith.constant 8 : index
    %79 = vector.load %arg11[%c0_60, %c8_61] : memref<8x576xf32, #tpu.memory_space<vmem>>, vector<8x528xf32>
    %c8_62 = arith.constant 8 : index
    %c0_63 = arith.constant 0 : index
    %80 = vector.load %arg12[%c8_62, %c0_63] : memref<72x528xf32, #tpu.memory_space<vmem>>, vector<8x528xf32>
    tpu.vector_store %arg12[%c8_62, %c0_63], %79 {strides = array<i32>} : memref<72x528xf32, #tpu.memory_space<vmem>>, vector<8x528xf32>,
    %c0_64 = arith.constant 0 : index
    %c9_65 = arith.constant 9 : index
    %81 = vector.load %arg11[%c0_64, %c9_65] : memref<8x576xf32, #tpu.memory_space<vmem>>, vector<8x528xf32>
    %82 = vector.broadcast %1 : vector<1x528xf32> to vector<8x528xf32>
    %83 = arith.mulf %81, %82 : vector<8x528xf32>
    %c16_66 = arith.constant 16 : index
    %c0_67 = arith.constant 0 : index
    %84 = vector.load %arg12[%c16_66, %c0_67] : memref<72x528xf32, #tpu.memory_space<vmem>>, vector<8x528xf32>
    tpu.vector_store %arg12[%c16_66, %c0_67], %83 {strides = array<i32>} : memref<72x528xf32, #tpu.memory_space<vmem>>, vector<8x528xf32>,
    %c0_68 = arith.constant 0 : index
    %c23_69 = arith.constant 23 : index
    %85 = vector.load %arg11[%c0_68, %c23_69] : memref<8x576xf32, #tpu.memory_space<vmem>>, vector<8x528xf32>
    %86 = vector.broadcast %0 : vector<1x528xf32> to vector<8x528xf32>
    %87 = arith.mulf %85, %86 : vector<8x528xf32>
    %c24_70 = arith.constant 24 : index
    %c0_71 = arith.constant 0 : index
    %88 = vector.load %arg12[%c24_70, %c0_71] : memref<72x528xf32, #tpu.memory_space<vmem>>, vector<8x528xf32>
    tpu.vector_store %arg12[%c24_70, %c0_71], %87 {strides = array<i32>} : memref<72x528xf32, #tpu.memory_space<vmem>>, vector<8x528xf32>,
    %c0_72 = arith.constant 0 : index
    %c24_73 = arith.constant 24 : index
    %89 = vector.load %arg11[%c0_72, %c24_73] : memref<8x576xf32, #tpu.memory_space<vmem>>, vector<8x528xf32>
    %c32_74 = arith.constant 32 : index
    %c0_75 = arith.constant 0 : index
    %90 = vector.load %arg12[%c32_74, %c0_75] : memref<72x528xf32, #tpu.memory_space<vmem>>, vector<8x528xf32>
    tpu.vector_store %arg12[%c32_74, %c0_75], %89 {strides = array<i32>} : memref<72x528xf32, #tpu.memory_space<vmem>>, vector<8x528xf32>,
    %c0_76 = arith.constant 0 : index
    %c25_77 = arith.constant 25 : index
    %91 = vector.load %arg11[%c0_76, %c25_77] : memref<8x576xf32, #tpu.memory_space<vmem>>, vector<8x528xf32>
    %92 = vector.broadcast %1 : vector<1x528xf32> to vector<8x528xf32>
    %93 = arith.mulf %91, %92 : vector<8x528xf32>
    %c40_78 = arith.constant 40 : index
    %c0_79 = arith.constant 0 : index
    %94 = vector.load %arg12[%c40_78, %c0_79] : memref<72x528xf32, #tpu.memory_space<vmem>>, vector<8x528xf32>
    tpu.vector_store %arg12[%c40_78, %c0_79], %93 {strides = array<i32>} : memref<72x528xf32, #tpu.memory_space<vmem>>, vector<8x528xf32>,
    %c0_80 = arith.constant 0 : index
    %c39_81 = arith.constant 39 : index
    %95 = vector.load %arg11[%c0_80, %c39_81] : memref<8x576xf32, #tpu.memory_space<vmem>>, vector<8x528xf32>
    %96 = vector.broadcast %0 : vector<1x528xf32> to vector<8x528xf32>
    %97 = arith.mulf %95, %96 : vector<8x528xf32>
    %c48_82 = arith.constant 48 : index
    %c0_83 = arith.constant 0 : index
    %98 = vector.load %arg12[%c48_82, %c0_83] : memref<72x528xf32, #tpu.memory_space<vmem>>, vector<8x528xf32>
    tpu.vector_store %arg12[%c48_82, %c0_83], %97 {strides = array<i32>} : memref<72x528xf32, #tpu.memory_space<vmem>>, vector<8x528xf32>,
    %c0_84 = arith.constant 0 : index
    %c40_85 = arith.constant 40 : index
    %99 = vector.load %arg11[%c0_84, %c40_85] : memref<8x576xf32, #tpu.memory_space<vmem>>, vector<8x528xf32>
    %c56_86 = arith.constant 56 : index
    %c0_87 = arith.constant 0 : index
    %100 = vector.load %arg12[%c56_86, %c0_87] : memref<72x528xf32, #tpu.memory_space<vmem>>, vector<8x528xf32>
    tpu.vector_store %arg12[%c56_86, %c0_87], %99 {strides = array<i32>} : memref<72x528xf32, #tpu.memory_space<vmem>>, vector<8x528xf32>,
    %c0_88 = arith.constant 0 : index
    %c41_89 = arith.constant 41 : index
    %101 = vector.load %arg11[%c0_88, %c41_89] : memref<8x576xf32, #tpu.memory_space<vmem>>, vector<8x528xf32>
    %102 = vector.broadcast %1 : vector<1x528xf32> to vector<8x528xf32>
    %103 = arith.mulf %101, %102 : vector<8x528xf32>
    %c64_90 = arith.constant 64 : index
    %c0_91 = arith.constant 0 : index
    %104 = vector.load %arg12[%c64_90, %c0_91] : memref<72x528xf32, #tpu.memory_space<vmem>>, vector<8x528xf32>
    tpu.vector_store %arg12[%c64_90, %c0_91], %103 {strides = array<i32>} : memref<72x528xf32, #tpu.memory_space<vmem>>, vector<8x528xf32>,
    %c0_92 = arith.constant 0 : index
    %c0_93 = arith.constant 0 : index
    %105 = vector.load %arg4[%c0_92, %c0_93] : memref<8x72xf32, #tpu.memory_space<vmem>>, vector<8x72xf32>
    %c0_94 = arith.constant 0 : index
    %c0_95 = arith.constant 0 : index
    %106 = vector.load %arg12[%c0_94, %c0_95] : memref<72x528xf32, #tpu.memory_space<vmem>>, vector<72x528xf32>
    %cst_96 = arith.constant dense<0.000000e+00> : vector<8x528xf32>
    %107 = tpu.matmul %105, %106, %cst_96 {dimension_numbers = #tpu.dot_dimension_numbers<[1], [0], [0], [1], [0, 0, 1, 1], [], []>} : vector<8x72xf32>, vector<72x528xf32>, vector<8x528xf32> -> vector<8x528xf32>
    %108 = vector.broadcast %2 : vector<1x528xf32> to vector<8x528xf32>
    %109 = arith.mulf %107, %108 : vector<8x528xf32>
    %cst_97 = arith.constant dense<0.000000e+00> : vector<8xf32>
    %110 = vector.multi_reduction <add>, %109, %cst_97 [1] : vector<8x528xf32> to vector<8xf32>
    %111 = vector.shape_cast %110 : vector<8xf32> to vector<8x1xf32>
    %112 = arith.mulf %109, %107 : vector<8x528xf32>
    %cst_98 = arith.constant dense<0.000000e+00> : vector<8xf32>
    %113 = vector.multi_reduction <add>, %112, %cst_98 [1] : vector<8x528xf32> to vector<8xf32>
    %114 = vector.shape_cast %113 : vector<8xf32> to vector<8x1xf32>
    %cst_99 = arith.constant 0.001953125 : f32
    %115 = vector.broadcast %cst_99 : f32 to vector<8x1xf32>
    %116 = arith.mulf %111, %115 : vector<8x1xf32>
    %cst_100 = arith.constant 0.001953125 : f32
    %117 = vector.broadcast %cst_100 : f32 to vector<8x1xf32>
    %118 = arith.mulf %114, %117 : vector<8x1xf32>
    %119 = arith.mulf %116, %116 : vector<8x1xf32>
    %120 = arith.subf %118, %119 : vector<8x1xf32>
    %c0_101 = arith.constant 0 : index
    %c0_102 = arith.constant 0 : index
    %121 = vector.load %arg5[%c0_101, %c0_102] : memref<8x1xf32, #tpu.memory_space<vmem>>, vector<8x1xf32>
    %cst_103 = arith.constant 9.99999974E-6 : f32
    %122 = vector.broadcast %cst_103 : f32 to vector<8x1xf32>
    %123 = arith.addf %120, %122 : vector<8x1xf32>
    %124 = math.rsqrt %123 : vector<8x1xf32>
    %125 = arith.mulf %121, %124 : vector<8x1xf32>
    %c0_104 = arith.constant 0 : index
    %c0_105 = arith.constant 0 : index
    %126 = vector.load %arg6[%c0_104, %c0_105] : memref<8x1xf32, #tpu.memory_space<vmem>>, vector<8x1xf32>
    %127 = arith.mulf %116, %125 : vector<8x1xf32>
    %128 = arith.subf %126, %127 : vector<8x1xf32>
    %129 = vector.broadcast %125 : vector<8x1xf32> to vector<8x528xf32>
    %130 = arith.mulf %107, %129 : vector<8x528xf32>
    %131 = vector.broadcast %128 : vector<8x1xf32> to vector<8x528xf32>
    %132 = arith.addf %130, %131 : vector<8x528xf32>
    %133 = vector.extract_strided_slice %132 {offsets = [0, 0], sizes = [8, 256], strides = [1, 1]} : vector<8x528xf32> to vector<8x256xf32>
    %c0_106 = arith.constant 0 : index
    %c0_107 = arith.constant 0 : index
    %c0_108 = arith.constant 0 : index
    %134 = vector.load %arg0[%c0_106, %c0_107, %c0_108] : memref<2x8x256xf32, #tpu.memory_space<vmem>>, vector<1x8x256xf32>
    %135 = vector.shape_cast %134 : vector<1x8x256xf32> to vector<8x256xf32>
    %136 = arith.addf %133, %135 : vector<8x256xf32>
    %cst_109 = arith.constant 0.000000e+00 : f32
    %137 = vector.broadcast %cst_109 : f32 to vector<8x256xf32>
    %138 = arith.maximumf %136, %137 : vector<8x256xf32>
    %c0_110 = arith.constant 0 : index
    %c0_111 = arith.constant 0 : index
    %c0_112 = arith.constant 0 : index
    %139 = vector.load %arg10[%c0_110, %c0_111, %c0_112] : memref<2x8x256xf32, #tpu.memory_space<vmem>>, vector<1x8x256xf32>
    %140 = vector.shape_cast %139 : vector<1x8x256xf32> to vector<8x256xf32>
    %141 = vector.shape_cast %138 : vector<8x256xf32> to vector<1x8x256xf32>
    tpu.vector_store %arg10[%c0_110, %c0_111, %c0_112], %141 {strides = array<i32>} : memref<2x8x256xf32, #tpu.memory_space<vmem>>, vector<1x8x256xf32>,
    %142 = vector.extract_strided_slice %132 {offsets = [0, 272], sizes = [8, 256], strides = [1, 1]} : vector<8x528xf32> to vector<8x256xf32>
    %c1_113 = arith.constant 1 : index
    %c0_114 = arith.constant 0 : index
    %c0_115 = arith.constant 0 : index
    %143 = vector.load %arg0[%c1_113, %c0_114, %c0_115] : memref<2x8x256xf32, #tpu.memory_space<vmem>>, vector<1x8x256xf32>
    %144 = vector.shape_cast %143 : vector<1x8x256xf32> to vector<8x256xf32>
    %145 = arith.addf %142, %144 : vector<8x256xf32>
    %cst_116 = arith.constant 0.000000e+00 : f32
    %146 = vector.broadcast %cst_116 : f32 to vector<8x256xf32>
    %147 = arith.maximumf %145, %146 : vector<8x256xf32>
    %c1_117 = arith.constant 1 : index
    %c0_118 = arith.constant 0 : index
    %c0_119 = arith.constant 0 : index
    %148 = vector.load %arg10[%c1_117, %c0_118, %c0_119] : memref<2x8x256xf32, #tpu.memory_space<vmem>>, vector<1x8x256xf32>
    %149 = vector.shape_cast %148 : vector<1x8x256xf32> to vector<8x256xf32>
    %150 = vector.shape_cast %147 : vector<8x256xf32> to vector<1x8x256xf32>
    tpu.vector_store %arg10[%c1_117, %c0_118, %c0_119], %150 {strides = array<i32>} : memref<2x8x256xf32, #tpu.memory_space<vmem>>, vector<1x8x256xf32>,
    return
  }
}

</mosaic_0001>

<bundles_post_ra>
// kernel: residual_block_forward.1
= control target key start
LH: loop header
LB: loop body
LE: loop exit
PB: predicated region body
PF: predicated region fallthrough
CT: control target
= control target key end

     0   :  { %s1456_s19 = smov 40   ;;  %s1457_s20 = smov 24   ;;  %vm42_vm0 = vcmask 523264   ;;  %v1464_v16 = vmov 0.0   ;;  %vm70_vm1 = vcmask 326656   ;;  %vm52_vm2 = vcmask 195584   ;;  %s2132_s0 = inlined_call_operand.vmem [shape: f32[2,8,256], index: 0, kind: input, shape index: {}]   ;;  %s2133_s8 = inlined_call_operand.vmem [shape: f32[1,528], index: 8, kind: input, shape index: {}]   ;;  %s2134_s7 = inlined_call_operand.vmem [shape: f32[1,528], index: 7, kind: input, shape index: {}]   ;;  %s2135_s1 = inlined_call_operand.vmem [shape: f32[8,72], index: 1, kind: input, shape index: {}]   ;;  %s2136_s9 = inlined_call_operand.vmem [shape: f32[1,528], index: 9, kind: input, shape index: {}]   ;;  %s2137_s2 = inlined_call_operand.vmem [shape: f32[8,1], index: 2, kind: input, shape index: {}]   ;;  %s2138_s3 = inlined_call_operand.vmem [shape: f32[8,1], index: 3, kind: input, shape index: {}]   ;;  %s2139_s4 = inlined_call_operand.vmem [shape: f32[8,72], index: 4, kind: input, shape index: {}]   ;;  %s2140_s5 = inlined_call_operand.vmem [shape: f32[8,1], index: 5, kind: input, shape index: {}]   ;;  %s2141_s6 = inlined_call_operand.vmem [shape: f32[8,1], index: 6, kind: input, shape index: {}]   ;;  %s2142_s10 = inlined_call_operand.vmem [shape: f32[2,8,256], index: 10, kind: output, shape index: {}]  }
   0x1   :  { %v1414_v0 = vld [vmem:[%s2132_s0 + $0x18] sm:$0xff]  ;;  %v45_v1 = vld [vmem:[%s2132_s0 + $0x8] sm:$0xff]  ;;  %v36_v2 = vld [vmem:[%s2133_s8] sm:$0x1f]  ;;  %s1458_s21 = smov 41   ;;  %s1459_s27 = smov 39  }
   0x2   :  { %68 = vrot.lane.b32.xlu1 %v1414_v0, %s1456_s19  ;;  %50 = vrot.lane.b32.xlu0 %v45_v1, %s1457_s20  ;;  %v188_v3 = vperm.slane %v36_v2, 1  ;;  %v1413_v4 = vld [vmem:[%s2132_s0 + $0x10] sm:$0xff]  ;;  %v44_v5 = vld [vmem:[%s2132_s0] sm:$0xff]  ;;  %v189_v6 = vperm.slane %v36_v2, 2  ;;  %v190_v7 = vperm.slane %v36_v2, 3  ;;  %v187_v8 = vperm.slane %v36_v2, 0 }
   0x3   :  { %v191_v9 = vperm.slane %v36_v2, 4  ;;  %v35_v10 = vld [vmem:[%s2134_s7] sm:$0x1f]  ;;  %s1460_s28 = smov 25   ;;  %s1461_s29 = smov 23   ;;  %43 = vst.msk [vmem:[#allocation2 + $0x20] sm:$0xff] %vm42_vm0, %v1464_v16 }
   0x4   :  { %504 = vrot.lane.b32.xlu2 %v188_v3, %s1458_s21  ;;  %v86_v11 = vperm.slane %v35_v10, 1  ;;  %v87_v12 = vperm.slane %v35_v10, 2  ;;  %v88_v13 = vperm.slane %v35_v10, 3  ;;  %v85_v14 = vperm.slane %v35_v10, 0  ;;  %s1462_s7 = smov 9   ;;  %s1463_s30 = smov 7  }
   0x5   :  { %v89_v15 = vperm.slane %v35_v10, 4  ;;  %38 = vst [vmem:[#allocation2] sm:$0xff] %v1464_v16  ;;  %vm75_vm3 = vcmask 1047872   ;;  %vm57_vm4 = vcmask 1047744   ;;  %s1465_s11 = smov 88   ;;  %vm512_vm5 = vcmask 334848  }
   0x6   :  { %40 = vst [vmem:[#allocation2 + $0x10] sm:$0xff] %v1464_v16  ;;  %s1466_s12 = smov 87   ;;  %vm357_vm6 = vcmask 203776   ;;  %s1467_s13 = smov 89   ;;  %vm417_vm7 = vcmask 318464   ;;  %vm202_vm8 = vcmask 72704  }
   0x7   :  { %s1468_s14 = smov 103   ;;  %s1469_s15 = smov 104   ;;  %vm262_vm9 = vcmask 187392   ;;  %vm100_vm10 = vcmask 56320   ;;  %vm144_vm11 = vcmask 130048   ;;  %vm542_vm12 = vcmask 711680  }
   0x8   :  { %s1470_s16 = smov 119   ;;  %s1471_s17 = smov 105   ;;  %vm482_vm13 = vcmask 719872   ;;  %vm447_vm14 = vcmask 728064   ;;  %vm387_vm15 = vcmask 842752   ;;  %vm327_vm0 = vcmask 850944  }
   0x9   :  { %s1472_s18 = smov 120   ;;  %s1475_s26 = smov 16  }
   0xa   :  { %66 = vrot.lane.b32.xlu0 %v1413_v4, %s1456_s19  ;;  %48 = vrot.lane.b32.xlu1 %v44_v5, %s1457_s20  ;;  %s1473_s19 = smov 121  }
   0xc   :  { %506 = vrot.lane.b32.xlu2 %v189_v6, %s1458_s21 }
  0x12   :  { %508 = vrot.lane.b32.xlu0 %v190_v7, %s1458_s21  ;;  %502 = vrot.lane.b32.xlu1 %v187_v8, %s1458_s21 }
  0x14   :  { %510 = vrot.lane.b32.xlu2 %v191_v9, %s1458_s21 }
  0x1a   :  { %409 = vrot.lane.b32.xlu0 %v86_v11, %s1459_s27  ;;  %411 = vrot.lane.b32.xlu1 %v87_v12, %s1459_s27 }
  0x1c   :  { %413 = vrot.lane.b32.xlu2 %v88_v13, %s1459_s27 }
  0x22   :  { %407 = vrot.lane.b32.xlu0 %v85_v14, %s1459_s27  ;;  %349 = vrot.lane.b32.xlu1 %v188_v3, %s1460_s28 }
  0x24   :  { %351 = vrot.lane.b32.xlu2 %v189_v6, %s1460_s28 }
  0x2a   :  { %353 = vrot.lane.b32.xlu0 %v190_v7, %s1460_s28  ;;  %415 = vrot.lane.b32.xlu1 %v89_v15, %s1459_s27 }
  0x2c   :  { %347 = vrot.lane.b32.xlu2 %v187_v8, %s1460_s28 }
  0x32   :  { %355 = vrot.lane.b32.xlu0 %v191_v9, %s1460_s28  ;;  %254 = vrot.lane.b32.xlu1 %v86_v11, %s1461_s29 }
  0x34   :  { %256 = vrot.lane.b32.xlu2 %v87_v12, %s1461_s29 }
  0x3a   :  { %258 = vrot.lane.b32.xlu0 %v88_v13, %s1461_s29  ;;  %252 = vrot.lane.b32.xlu1 %v85_v14, %s1461_s29 }
  0x3c   :  { %194 = vrot.lane.b32.xlu2 %v188_v3, %s1462_s7 }
  0x42   :  { %196 = vrot.lane.b32.xlu0 %v189_v6, %s1462_s7  ;;  %198 = vrot.lane.b32.xlu1 %v190_v7, %s1462_s7 }
  0x44   :  { %260 = vrot.lane.b32.xlu2 %v89_v15, %s1461_s29 }
  0x4a   :  { %192 = vrot.lane.b32.xlu0 %v187_v8, %s1462_s7  ;;  %200 = vrot.lane.b32.xlu1 %v191_v9, %s1462_s7 }
  0x4c   :  { %92 = vrot.lane.b32.xlu2 %v86_v11, %s1463_s30 }
  0x52   :  { %94 = vrot.lane.b32.xlu0 %v87_v12, %s1463_s30  ;;  %96 = vrot.lane.b32.xlu1 %v88_v13, %s1463_s30 }
  0x54   :  { %90 = vrot.lane.b32.xlu2 %v85_v14, %s1463_s30 }
  0x5a   :  { %98 = vrot.lane.b32.xlu0 %v89_v15, %s1463_s30 }
  0x5e   :  { %v505_v17 = vpop.permute.xlu2 %504 }
  0x66   :  { %v507_v20 = vpop.permute.xlu2 %506 }
  0x67   :  { %v1600_v43 = vsel %vm512_vm5, %v505_v17, %v507_v20 }
  0x6e   :  { %v511_v24 = vpop.permute.xlu2 %510 }
  0x74   :  { %v69_v18 = vpop.permute.xlu1 %68  ;;  %v51_v19 = vpop.permute.xlu0 %50 }
  0x75   :  { %78 = vst.msk [vmem:[#allocation2 + $0x20] sm:$0xff] %vm70_vm1, %v69_v18 }
  0x76   :  { %60 = vst.msk [vmem:[#allocation2 + $0x10] sm:$0xff] %vm52_vm2, %v51_v19  ;;  %v414_v34 = vpop.permute.xlu2 %413 }
  0x7c   :  { %v67_v21 = vpop.permute.xlu0 %66  ;;  %v49_v22 = vpop.permute.xlu1 %48  ;;  %v1554_v23 = vld [vmem:[#allocation2 + $0x20] sm:$0xff] }
  0x7d   :  { %76 = vst.msk [vmem:[#allocation2 + $0x10] sm:$0xff] %vm75_vm3, %v67_v21  ;;  %480 = vrot.lane.b32.xlu0 %v1554_v23, %s1465_s11  ;;  %v1561_v25 = vsel %vm70_vm1, %v67_v21, %v69_v18  ;;  %v1578_v31 = vsel %vm52_vm2, %v49_v22, %v51_v19 }
  0x7e   :  { %58 = vst.msk [vmem:[#allocation2] sm:$0xff] %vm57_vm4, %v49_v22  ;;  %v352_v40 = vpop.permute.xlu2 %351 }
  0x84   :  { %v509_v26 = vpop.permute.xlu0 %508  ;;  %v1563_v27 = vpop.permute.xlu1 %502  ;;  %v1580_v35 = vld [vmem:[#allocation2 + $0x10] sm:$0xff] }
  0x85   :  { %v1566_v28 = vsel %vm512_vm5, %v509_v26, %v511_v24  ;;  %v1568_v29 = vld [vmem:[#allocation2] sm:$0xff]  ;;  %478 = vrot.lane.b32.xlu0 %v1561_v25, %s1465_s11  ;;  %v524_v46 = vmul.f32 %v1600_v43, %v1580_v35  ;;  %v1614_v49 = vsel %vm512_vm5, %v1563_v27, %v505_v17  ;;  %v1619_v51 = vsel %vm512_vm5, %v507_v20, %v509_v26 }
  0x86   :  { %v526_v30 = vmul.f32 %v1566_v28, %v1554_v23  ;;  %472 = vrot.lane.b32.xlu2 %v1568_v29, %s1465_s11  ;;  %v522_v36 = vmul.f32 %v1563_v27, %v1568_v29  ;;  %v1616_v50 = vpop.permute.xlu2 %347  ;;  %v523_v53 = vmul.f32 %v1614_v49, %v1578_v31  ;;  %v525_v54 = vmul.f32 %v1619_v51, %v1561_v25 }
  0x87   :  { %v367_v52 = vmul.f32 %v1568_v29, %v1616_v50  ;;  %vm292_vm5 = vcmask 859136  }
  0x88   :  { %540 = vrot.lane.b32.xlu1 %v526_v30, %s1466_s12 }
  0x8c   :  { %v410_v32 = vpop.permute.xlu0 %409  ;;  %v412_v33 = vpop.permute.xlu1 %411 }
  0x8d   :  { %474 = vrot.lane.b32.xlu0 %v1578_v31, %s1465_s11  ;;  %v1631_v56 = vsel %vm417_vm7, %v410_v32, %v412_v33  ;;  %v1634_v57 = vsel %vm417_vm7, %v412_v33, %v414_v34 }
  0x8e   :  { %476 = vrot.lane.b32.xlu2 %v1580_v35, %s1465_s11  ;;  %v429_v58 = vmul.f32 %v1631_v56, %v1580_v35  ;;  %v430_v59 = vmul.f32 %v1634_v57, %v1561_v25  ;;  %v257_v63 = vpop.permute.xlu2 %256 }
  0x94   :  { %v1588_v37 = vpop.permute.xlu0 %407  ;;  %v350_v38 = vpop.permute.xlu1 %349 }
  0x95   :  { %v427_v39 = vmul.f32 %v1568_v29, %v1588_v37  ;;  %532 = vrot.lane.b32.xlu0 %v522_v36, %s1466_s12  ;;  %v1595_v41 = vsel %vm357_vm6, %v350_v38, %v352_v40  ;;  %v1649_v61 = vsel %vm417_vm7, %v1588_v37, %v410_v32  ;;  %v1661_v2 = vsel %vm357_vm6, %v1616_v50, %v350_v38 }
  0x96   :  { %v369_v42 = vmul.f32 %v1580_v35, %v1595_v41  ;;  %v428_v1 = vmul.f32 %v1649_v61, %v1578_v31  ;;  %v368_v3 = vmul.f32 %v1661_v2, %v1578_v31  ;;  %v195_v5 = vpop.permute.xlu2 %194 }
  0x97   :  { %437 = vrot.lane.b32.xlu1 %v427_v39, %s1467_s13 }
  0x9c   :  { %v416_v44 = vpop.permute.xlu1 %415  ;;  %v354_v48 = vpop.permute.xlu0 %353 }
  0x9d   :  { %v1603_v45 = vsel %vm417_vm7, %v414_v34, %v416_v44  ;;  %381 = vrot.lane.b32.xlu0 %v369_v42, %s1468_s14  ;;  %v1645_v60 = vsel %vm357_vm6, %v352_v40, %v354_v48  ;;  %vm166_vm7 = vcmask 982016  }
  0x9e   :  { %v431_v47 = vmul.f32 %v1554_v23, %v1603_v45  ;;  %v370_v0 = vmul.f32 %v1645_v60, %v1561_v25  ;;  %v261_v16 = vpop.permute.xlu2 %260 }
  0x9f   :  { %536 = vrot.lane.b32.xlu1 %v524_v46, %s1466_s12 }
  0xa0   :  { %445 = vrot.lane.b32.xlu2 %v431_v47, %s1467_s13 }
  0xa4   :  { %v356_v55 = vpop.permute.xlu0 %355  ;;  %v255_v6 = vpop.permute.xlu1 %254 }
  0xa5   :  { %377 = vrot.lane.b32.xlu0 %v367_v52, %s1468_s14  ;;  %v1674_v8 = vsel %vm357_vm6, %v354_v48, %v356_v55  ;;  %v1689_v13 = vsel %vm262_vm9, %v255_v6, %v257_v63  ;;  %vm232_vm6 = vcmask 973824  }
  0xa6   :  { %v371_v10 = vmul.f32 %v1554_v23, %v1674_v8  ;;  %v274_v17 = vmul.f32 %v1580_v35, %v1689_v13  ;;  %v93_v22 = vpop.permute.xlu2 %92 }
  0xa7   :  { %534 = vrot.lane.b32.xlu1 %v523_v53, %s1466_s12 }
  0xa8   :  { %538 = vrot.lane.b32.xlu2 %v525_v54, %s1466_s12 }
  0xac   :  { %v259_v62 = vpop.permute.xlu0 %258  ;;  %v1686_v12 = vpop.permute.xlu1 %252 }
  0xad   :  { %323 = vrot.lane.b32.xlu0 %v1561_v25, %s1469_s15  ;;  %v1692_v14 = vsel %vm262_vm9, %v257_v63, %v259_v62  ;;  %v1705_v19 = vsel %vm262_vm9, %v1686_v12, %v255_v6  ;;  %v272_v21 = vmul.f32 %v1568_v29, %v1686_v12  ;;  %v1719_v30 = vsel %vm262_vm9, %v259_v62, %v261_v16 }
  0xae   :  { %v275_v18 = vmul.f32 %v1692_v14, %v1561_v25  ;;  %v273_v24 = vmul.f32 %v1705_v19, %v1578_v31  ;;  %v276_v36 = vmul.f32 %v1554_v23, %v1719_v30  ;;  %v1728_v38 = vpop.permute.xlu2 %90  ;;  %vm2143_vm9 = vcmask 588800  }
  0xaf   :  { %441 = vrot.lane.b32.xlu1 %v429_v58, %s1467_s13 }
  0xb0   :  { %443 = vrot.lane.b32.xlu2 %v430_v59, %s1467_s13 }
  0xb4   :  { %v197_v4 = vpop.permute.xlu0 %196  ;;  %v199_v20 = vpop.permute.xlu1 %198 }
  0xb5   :  { %319 = vrot.lane.b32.xlu0 %v1578_v31, %s1469_s15  ;;  %v1669_v7 = vsel %vm202_vm8, %v195_v5, %v197_v4  ;;  %v1716_v26 = vsel %vm202_vm8, %v197_v4, %v199_v20 }
  0xb6   :  { %v214_v9 = vmul.f32 %v1580_v35, %v1669_v7  ;;  %v215_v33 = vmul.f32 %v1716_v26, %v1561_v25 }
  0xb7   :  { %383 = vrot.lane.b32.xlu1 %v370_v0, %s1468_s14 }
  0xb8   :  { %439 = vrot.lane.b32.xlu2 %v428_v1, %s1467_s13 }
  0xbc   :  { %v1682_v11 = vpop.permute.xlu0 %192  ;;  %v201_v34 = vpop.permute.xlu1 %200 }
  0xbd   :  { %325 = vrot.lane.b32.xlu0 %v1554_v23, %s1469_s15  ;;  %v212_v15 = vmul.f32 %v1568_v29, %v1682_v11  ;;  %v1733_v39 = vsel %vm202_vm8, %v1682_v11, %v195_v5  ;;  %v1746_v48 = vsel %vm202_vm8, %v199_v20, %v201_v34  ;;  %vm2144_vm8 = vcmask 990208  }
  0xbe   :  { %v213_v42 = vmul.f32 %v1733_v39, %v1578_v31  ;;  %v216_v53 = vmul.f32 %v1554_v23, %v1746_v48 }
  0xbf   :  { %379 = vrot.lane.b32.xlu1 %v368_v3, %s1468_s14  ;;  %v1771_v3 = vsel %vm100_vm10, %v1728_v38, %v93_v22 }
  0xc0   :  { %321 = vrot.lane.b32.xlu2 %v1580_v35, %s1469_s15 }
  0xc4   :  { %v95_v32 = vpop.permute.xlu0 %94  ;;  %v97_v44 = vpop.permute.xlu1 %96 }
  0xc5   :  { %226 = vrot.lane.b32.xlu0 %v214_v9, %s1470_s16  ;;  %v1758_v55 = vsel %vm100_vm10, %v93_v22, %v95_v32  ;;  %v1761_v59 = vsel %vm100_vm10, %v95_v32, %v97_v44 }
  0xc6   :  { %v113_v62 = vmul.f32 %v1761_v59, %v1561_v25 }
  0xc7   :  { %385 = vrot.lane.b32.xlu1 %v371_v10, %s1468_s14 }
  0xc8   :  { %317 = vrot.lane.b32.xlu2 %v1568_v29, %s1469_s15 }
  0xcc   :  { %v99_v40 = vpop.permute.xlu0 %98 }
  0xcd   :  { %222 = vrot.lane.b32.xlu0 %v212_v15, %s1470_s16  ;;  %v1741_v46 = vsel %vm100_vm10, %v97_v44, %v99_v40 }
  0xce   :  { %v114_v52 = vmul.f32 %v1554_v23, %v1741_v46 }
  0xcf   :  { %286 = vrot.lane.b32.xlu1 %v274_v17, %s1471_s17 }
  0xd0   :  { %288 = vrot.lane.b32.xlu2 %v275_v18, %s1471_s17 }
  0xd5   :  { %162 = vrot.lane.b32.xlu0 %v1561_v25, %s1472_s18  ;;  %v111_v25 = vmul.f32 %v1771_v3, %v1578_v31 }
  0xd7   :  { %282 = vrot.lane.b32.xlu1 %v272_v21, %s1471_s17 }
  0xd8   :  { %284 = vrot.lane.b32.xlu2 %v273_v24, %s1471_s17 }
  0xdd   :  { %158 = vrot.lane.b32.xlu0 %v1578_v31, %s1472_s18 }
  0xdf   :  { %228 = vrot.lane.b32.xlu1 %v215_v33, %s1470_s16 }
  0xe0   :  { %290 = vrot.lane.b32.xlu2 %v276_v36, %s1471_s17  ;;  %v473_v47 = vpop.permute.xlu2 %472 }
  0xe5   :  { %164 = vrot.lane.b32.xlu0 %v1554_v23, %s1472_s18  ;;  %v112_v23 = vmul.f32 %v1580_v35, %v1758_v55 }
  0xe7   :  { %224 = vrot.lane.b32.xlu1 %v213_v42, %s1470_s16 }
  0xe8   :  { %160 = vrot.lane.b32.xlu2 %v1580_v35, %s1472_s18  ;;  %v477_v58 = vpop.permute.xlu2 %476  ;;  %v110_v35 = vmul.f32 %v1568_v29, %v1728_v38 }
  0xed   :  { %128 = vrot.lane.b32.xlu0 %v114_v52, %s1473_s19 }
  0xef   :  { %230 = vrot.lane.b32.xlu1 %v216_v53, %s1470_s16  ;;  %v481_v54 = vpop.permute.xlu0 %480 }
  0xf0   :  { %496 = vst.msk [vmem:[#allocation3 + $0x138] sm:$0xff] %vm144_vm11, %v481_v54  ;;  %156 = vrot.lane.b32.xlu2 %v1568_v29, %s1472_s18 }
  0xf7   :  { %124 = vrot.lane.b32.xlu1 %v112_v23, %s1473_s19  ;;  %v479_v63 = vpop.permute.xlu0 %478 }
  0xf8   :  { %126 = vrot.lane.b32.xlu2 %v113_v62, %s1473_s19  ;;  %v486_v9 = vsel %vm482_vm13, %v479_v63, %v481_v54  ;;  %v485_v21 = vsel %vm482_vm13, %v477_v58, %v479_v63 }
  0xfa   :  { %v446_v0 = vpop.permute.xlu2 %445  ;;  %v541_v1 = vpop.permute.xlu1 %540 }
  0xfb   :  { %461 = vst.msk [vmem:[#allocation3 + $0x110] sm:$0xff] %vm144_vm11, %v446_v0 }
  0xfc   :  { %556 = vst.msk [vmem:[#allocation3 + $0x160] sm:$0xff] %vm144_vm11, %v541_v1 }
  0xff   :  { %120 = vrot.lane.b32.xlu1 %v110_v35, %s1473_s19  ;;  %v475_v4 = vpop.permute.xlu0 %474 }
 0x100   :  { %122 = vrot.lane.b32.xlu2 %v111_v25, %s1473_s19  ;;  %v483_v36 = vsel %vm482_vm13, %v473_v47, %v475_v4  ;;  %v484_v40 = vsel %vm482_vm13, %v475_v4, %v477_v58 }
 0x102   :  { %v539_v5 = vpop.permute.xlu2 %538 }
 0x103   :  { %v546_v6 = vsel %vm542_vm12, %v539_v5, %v541_v1 }
 0x104   :  { %674 = vmatpush.msra.mxu3 %v546_v6 }
 0x106   :  { %675 = vmatpush.msra.mxu3 %v486_v9 }
 0x107   :  { %v533_v10 = vpop.permute.xlu0 %532 }
 0x109   :  { %v438_v29 = vpop.permute.xlu1 %437 }
 0x10a   :  { %v444_v15 = vpop.permute.xlu2 %443 }
 0x10b   :  { %v451_v31 = vsel %vm447_vm14, %v444_v15, %v446_v0 }
 0x10c   :  { %676 = vmatpush.msra.mxu3 %v451_v31 }
 0x10f   :  { %v382_v16 = vpop.permute.xlu0 %381 }
 0x111   :  { %v537_v17 = vpop.permute.xlu1 %536 }
 0x112   :  { %v545_v18 = vsel %vm542_vm12, %v537_v17, %v539_v5  ;;  %v440_v20 = vpop.permute.xlu2 %439 }
 0x113   :  { %654 = vmatpush.msra.mxu2 %v545_v18  ;;  %v448_v42 = vsel %vm447_vm14, %v438_v29, %v440_v20 }
 0x115   :  { %655 = vmatpush.msra.mxu2 %v485_v21 }
 0x117   :  { %v378_v22 = vpop.permute.xlu0 %377 }
 0x119   :  { %v535_v24 = vpop.permute.xlu1 %534 }
 0x11a   :  { %v543_v32 = vsel %vm542_vm12, %v533_v10, %v535_v24  ;;  %v544_v33 = vsel %vm542_vm12, %v535_v24, %v537_v17  ;;  %v322_v34 = vpop.permute.xlu2 %321 }
 0x11b   :  { %614 = vmatpush.msra.mxu0 %v543_v32  ;;  %634 = vmatpush.msra.mxu1 %v544_v33 }
 0x11d   :  { %615 = vmatpush.msra.mxu0 %v483_v36  ;;  %635 = vmatpush.msra.mxu1 %v484_v40 }
 0x11f   :  { %v324_v44 = vpop.permute.xlu0 %323  ;;  %616 = vmatpush.msra.mxu0 %v448_v42 }
 0x120   :  { %v330_v0 = vsel %vm327_vm0, %v322_v34, %v324_v44 }
 0x121   :  { %v442_v52 = vpop.permute.xlu1 %441 }
 0x122   :  { %v449_v53 = vsel %vm447_vm14, %v440_v20, %v442_v52  ;;  %v450_v54 = vsel %vm447_vm14, %v442_v52, %v444_v15  ;;  %v318_v23 = vpop.permute.xlu2 %317 }
 0x123   :  { %636 = vmatpush.msra.mxu1 %v449_v53  ;;  %656 = vmatpush.msra.mxu2 %v450_v54 }
 0x127   :  { %v320_v62 = vpop.permute.xlu0 %319 }
 0x128   :  { %v328_v6 = vsel %vm327_vm0, %v318_v23, %v320_v62  ;;  %v329_v9 = vsel %vm327_vm0, %v320_v62, %v322_v34 }
 0x129   :  { %v384_v47 = vpop.permute.xlu1 %383 }
 0x12a   :  { %v390_v58 = vsel %vm387_vm15, %v382_v16, %v384_v47  ;;  %v289_v63 = vpop.permute.xlu2 %288 }
 0x12b   :  { %657 = vmatpush.msra.mxu2 %v390_v58 }
 0x12d   :  { %658 = vmatpush.msra.mxu2 %v330_v0 }
 0x12f   :  { %v326_v1 = vpop.permute.xlu0 %325 }
 0x130   :  { %341 = vst.msk [vmem:[#allocation3 + $0xc0] sm:$0xff] %vm144_vm11, %v326_v1 }
 0x131   :  { %v380_v35 = vpop.permute.xlu1 %379 }
 0x132   :  { %v388_v25 = vsel %vm387_vm15, %v378_v22, %v380_v35  ;;  %v389_v4 = vsel %vm387_vm15, %v380_v35, %v382_v16  ;;  %v285_v5 = vpop.permute.xlu2 %284  ;;  %v331_v16 = vsel %vm327_vm0, %v324_v44, %v326_v1 }
 0x133   :  { %617 = vmatpush.msra.mxu0 %v388_v25  ;;  %637 = vmatpush.msra.mxu1 %v389_v4 }
 0x135   :  { %618 = vmatpush.msra.mxu0 %v328_v6  ;;  %638 = vmatpush.msra.mxu1 %v329_v9 }
 0x137   :  { %v227_v10 = vpop.permute.xlu0 %226 }
 0x139   :  { %v386_v29 = vpop.permute.xlu1 %385 }
 0x13a   :  { %v391_v15 = vsel %vm387_vm15, %v384_v47, %v386_v29  ;;  %401 = vst.msk [vmem:[#allocation3 + $0xe8] sm:$0xff] %vm144_vm11, %v386_v29  ;;  %v291_v31 = vpop.permute.xlu2 %290 }
 0x13b   :  { %306 = vst.msk [vmem:[#allocation3 + $0x98] sm:$0xff] %vm144_vm11, %v291_v31  ;;  %677 = vmatpush.msra.mxu3 %v391_v15  ;;  %v296_v17 = vsel %vm292_vm5, %v289_v63, %v291_v31 }
 0x13d   :  { %678 = vmatpush.msra.mxu3 %v331_v16  ;;  %v602_v16 = vld [vmem:[#allocation3 + $0x160] sm:$0xff] }
 0x13f   :  { %v223_v18 = vpop.permute.xlu0 %222  ;;  %679 = vmatpush.msra.mxu3 %v296_v17  ;;  %v597_v17 = vld [vmem:[#allocation3 + $0x138] sm:$0xff] }
 0x141   :  { %v287_v20 = vpop.permute.xlu1 %286 }
 0x142   :  { %v294_v21 = vsel %vm292_vm5, %v285_v5, %v287_v20  ;;  %v295_v22 = vsel %vm292_vm5, %v287_v20, %v289_v63  ;;  %v161_v34 = vpop.permute.xlu2 %160  ;;  %v587_v20 = vld [vmem:[#allocation3 + $0xe8] sm:$0xff] }
 0x143   :  { %639 = vmatpush.msra.mxu1 %v294_v21  ;;  %659 = vmatpush.msra.mxu2 %v295_v22  ;;  %v582_v21 = vld [vmem:[#allocation3 + $0xc0] sm:$0xff]  ;;  %v577_v22 = vld [vmem:[#allocation3 + $0x98] sm:$0xff] }
 0x147   :  { %v163_v24 = vpop.permute.xlu0 %162 }
 0x148   :  { %v169_v44 = vsel %vm166_vm7, %v161_v34, %v163_v24 }
 0x149   :  { %v283_v32 = vpop.permute.xlu1 %282 }
 0x14a   :  { %v293_v33 = vsel %vm292_vm5, %v283_v32, %v285_v5  ;;  %v157_v52 = vpop.permute.xlu2 %156  ;;  %v557_v5 = vld [vmem:[%s2135_s1] sm:$0xff] }
 0x14b   :  { %619 = vmatpush.msra.mxu0 %v293_v33 }
 0x14f   :  { %v159_v36 = vpop.permute.xlu0 %158 }
 0x150   :  { %v167_v47 = vsel %vm166_vm7, %v157_v52, %v159_v36  ;;  %v168_v58 = vsel %vm166_vm7, %v159_v36, %v161_v34  ;;  %v1834_v34 = vld [vmem:[%s2136_s9] sm:$0x1f] }
 0x151   :  { %v229_v40 = vpop.permute.xlu1 %228  ;;  %v708_v36 = vperm.slane %v1834_v34, 0 }
 0x152   :  { %v235_v42 = vsel %vm232_vm6, %v227_v10, %v229_v40  ;;  %v127_v63 = vpop.permute.xlu2 %126 }
 0x153   :  { %660 = vmatpush.msra.mxu2 %v235_v42 }
 0x155   :  { %661 = vmatpush.msra.mxu2 %v169_v44 }
 0x157   :  { %v165_v53 = vpop.permute.xlu0 %164 }
 0x158   :  { %180 = vst.msk [vmem:[#allocation3 + $0x48] sm:$0xff] %vm144_vm11, %v165_v53  ;;  %v170_v25 = vsel %vm166_vm7, %v163_v24, %v165_v53 }
 0x159   :  { %v225_v54 = vpop.permute.xlu1 %224 }
 0x15a   :  { %v233_v23 = vsel %vm232_vm6, %v223_v18, %v225_v54  ;;  %v234_v62 = vsel %vm232_vm6, %v225_v54, %v227_v10  ;;  %v123_v6 = vpop.permute.xlu2 %122  ;;  %v592_v18 = vld [vmem:[#allocation3 + $0x110] sm:$0xff]  ;;  %v710_v54 = vperm.slane %v1834_v34, 2 }
 0x15b   :  { %620 = vmatpush.msra.mxu0 %v233_v23  ;;  %640 = vmatpush.msra.mxu1 %v234_v62 }
 0x15d   :  { %621 = vmatpush.msra.mxu0 %v167_v47  ;;  %641 = vmatpush.msra.mxu1 %v168_v58 }
 0x15f   :  { %v129_v0 = vpop.permute.xlu0 %128  ;;  %v567_v32 = vld [vmem:[#allocation3 + $0x48] sm:$0xff] }
 0x160   :  { %145 = vst.msk [vmem:[#allocation3 + $0x20] sm:$0xff] %vm144_vm11, %v129_v0  ;;  %v134_v4 = vsel %vm2144_vm8, %v127_v63, %v129_v0 }
 0x161   :  { %v231_v1 = vpop.permute.xlu1 %230 }
 0x162   :  { %v236_v35 = vsel %vm232_vm6, %v229_v40, %v231_v1  ;;  %246 = vst.msk [vmem:[#allocation3 + $0x70] sm:$0xff] %vm144_vm11, %v231_v1  ;;  %v709_v40 = vperm.slane %v1834_v34, 1 }
 0x163   :  { %680 = vmatpush.msra.mxu3 %v236_v35 }
 0x165   :  { %681 = vmatpush.msra.mxu3 %v170_v25 }
 0x167   :  { %682 = vmatpush.msra.mxu3 %v134_v4  ;;  %v562_v33 = vld [vmem:[#allocation3 + $0x20] sm:$0xff] }
 0x168   :  { %1418 = vmatmul.msk.f32.vlgmr.msra.gmra.mxu3 %vm2143_vm9, %v557_v5 }
 0x169   :  { %v125_v9 = vpop.permute.xlu1 %124  ;;  %v572_v24 = vld [vmem:[#allocation3 + $0x70] sm:$0xff] }
 0x16a   :  { %v132_v10 = vsel %vm2144_vm8, %v123_v6, %v125_v9  ;;  %v133_v29 = vsel %vm2144_vm8, %v125_v9, %v127_v63  ;;  %v711_v63 = vperm.slane %v1834_v34, 3 }
 0x16b   :  { %642 = vmatpush.msra.mxu1 %v132_v10  ;;  %662 = vmatpush.msra.mxu2 %v133_v29 }
 0x16c   :  { %1417 = vmatmul.msk.f32.vlgmr.msra.gmra.mxu2 %vm2143_vm9, %v557_v5  ;;  %1416 = vmatmul.msk.f32.vlgmr.msra.gmra.mxu1 %vm2143_vm9, %v557_v5 }
 0x171   :  { %v121_v15 = vpop.permute.xlu1 %120 }
 0x172   :  { %v131_v31 = vsel %vm2144_vm8, %v121_v15, %v123_v6 }
 0x173   :  { %622 = vmatpush.msra.mxu0 %v131_v31 }
 0x174   :  { %1415 = vmatmul.msk.f32.vlgmr.msra.gmra.mxu0 %vm2143_vm9, %v557_v5 }
 0x175   :  { %694 = vmatpush.msrb.mxu0 %v602_v16 }
 0x177   :  { %695 = vmatpush.msrb.mxu0 %v597_v17 }
 0x179   :  { %696 = vmatpush.msrb.mxu0 %v592_v18 }
 0x17b   :  { %697 = vmatpush.msrb.mxu0 %v587_v20 }
 0x17d   :  { %698 = vmatpush.msrb.mxu0 %v582_v21 }
 0x17f   :  { %699 = vmatpush.msrb.mxu0 %v577_v22 }
 0x181   :  { %700 = vmatpush.msrb.mxu0 %v572_v24  ;;  %v1474_v24 = vmov 0  }
 0x182   :  { %1450 = vset.pattern.permute.xlu0 %v1474_v24  ;;  %1451 = vset.pattern.permute.xlu2 %v1474_v24 }
 0x183   :  { %701 = vmatpush.msrb.mxu0 %v567_v32 }
 0x185   :  { %702 = vmatpush.msrb.mxu0 %v562_v33 }
 0x186   :  { %1419 = vmatmul.msk.f32.vlgmr.msrb.gmra.mxu0 %vm2143_vm9, %v557_v5  ;;  %v712_v5 = vperm.slane %v1834_v34, 4 }
 0x1e9   :  { %v1840_v44 = vpop.f32.mrf.mxu1 }
 0x1ea   :  { %v719_v53 = vmul.f32 %v709_v40, %v1840_v44 }
 0x1eb   :  { %v684_v0 = vpop.f32.mrf.mxu3 }
 0x1ec   :  { %v731_v47 = vmul.f32 %v719_v53, %v1840_v44  ;;  %v721_v4 = vmul.f32 %v711_v63, %v684_v0 }
 0x1ee   :  { %v733_v9 = vmul.f32 %v721_v4, %v684_v0 }
 0x1ef   :  { %v664_v23 = vpop.f32.mrf.mxu2 }
 0x1f0   :  { %v720_v58 = vmul.f32 %v710_v54, %v664_v23 }
 0x1f1   :  { %v1838_v42 = vpop.f32.mrf.mxu0 }
 0x1f2   :  { %v718_v52 = vmul.f32 %v708_v36, %v1838_v42  ;;  %v732_v25 = vmul.f32 %v720_v58, %v664_v23 }
 0x1f4   :  { %v730_v62 = vmul.f32 %v718_v52, %v1838_v42  ;;  %v723_v1 = vadd.f32 %v719_v53, %v718_v52 }
 0x1f6   :  { %v735_v35 = vadd.f32 %v731_v47, %v730_v62  ;;  %v724_v6 = vadd.f32 %v723_v1, %v720_v58 }
 0x1f8   :  { %v736_v29 = vadd.f32 %v735_v35, %v732_v25  ;;  %v725_v31 = vadd.f32 %v724_v6, %v721_v4 }
 0x1fa   :  { %v737_v20 = vadd.f32 %v736_v29, %v733_v9  ;;  %v746_v9 = vld [vmem:[%s2137_s2] sm:$0xff] }
 0x203   :  { %v704_v10 = vpop.f32.mrf.mxu0 }
 0x204   :  { %v722_v15 = vmul.f32 %v712_v5, %v704_v10 }
 0x206   :  { %v734_v16 = vmul.f32 %v722_v15, %v704_v10  ;;  %v726_v17 = vsel %vm144_vm11, %v722_v15, 0.0 }
 0x207   :  { %v727_v18 = vadd.f32 %v726_v17, %v725_v31  ;;  %v759_v17 = vld [vmem:[%s2138_s3] sm:$0xff] }
 0x208   :  { %v738_v21 = vsel %vm144_vm11, %v734_v16, 0.0 }
 0x209   :  { %728 = vadd.xlane.f32.xlu1 %v727_v18  ;;  %v739_v22 = vadd.f32 %v738_v21, %v737_v20 }
 0x20b   :  { %740 = vadd.xlane.f32.xlu2 %v739_v22 }
 0x27c   :  { %v729_v32 = vpop.xlane.xlu1 %728 }
 0x27d   :  { %v742_v33 = vmul.f32 0.001953125, %v729_v32 }
 0x27e   :  { %v741_v52 = vpop.xlane.xlu2 %740 }
 0x27f   :  { %v744_v53 = vmul.f32 %v742_v33, %v742_v33  ;;  %v743_v62 = vmul.f32 0.001953125, %v741_v52 }
 0x281   :  { %v745_v47 = vsub.f32 %v743_v62, %v744_v53 }
 0x283   :  { %v747_v58 = vadd.f32 1e-05, %v745_v47 }
 0x285   :  { %1452 = vrsqrt.f32 %v747_v58  ;;  %vm754_vm9 = vweird.f32 %v747_v58 }
 0x28b   :  { %v1453_v1 = vpop.eup %1452 }
 0x28c   :  { %v749_v35 = vmul.f32 %v1453_v1, %v747_v58  ;;  %vm755_vm10 = vweird.f32 %v1453_v1 }
 0x28d   :  { %vm756_vm8 = vmor %vm754_vm9, %vm755_vm10 }
 0x28e   :  { %v750_v25 = vmul.f32 %v1453_v1, %v749_v35 }
 0x290   :  { %v751_v4 = vmul.f32 0.5, %v750_v25 }
 0x292   :  { %v752_v6 = vsub.f32 1.5, %v751_v4 }
 0x294   :  { %v753_v29 = vmul.f32 %v1453_v1, %v752_v6 }
 0x296   :  { %v757_v15 = vsel %vm756_vm8, %v1453_v1, %v753_v29  ;;  %vm1401_vm8 = vcmask 916480  }
 0x297   :  { %v758_v31 = vmul.f32 %v757_v15, %v746_v9 }
 0x299   :  { %764 = vperm.xlu0 %1450, %v758_v31   ;;  %v760_v16 = vmul.f32 %v758_v31, %v742_v33 }
 0x29b   :  { %v761_v18 = vsub.f32 %v759_v17, %v760_v16 }
 0x2a1   :  { %774 = vperm.xlu0 %1450, %v761_v18  }
 0x30b   :  { %v765_v20 = vpop.permute.xlu0 %764 }
 0x30c   :  { %v770_v21 = vmul.f32 %v765_v20, %v684_v0  ;;  %v769_v22 = vmul.f32 %v765_v20, %v664_v23  ;;  %v767_v24 = vmul.f32 %v765_v20, %v1838_v42  ;;  %v768_v33 = vmul.f32 %v765_v20, %v1840_v44 }
 0x30d   :  { %v771_v42 = vmul.f32 %v765_v20, %v704_v10 }
 0x313   :  { %v775_v32 = vpop.permute.xlu0 %774 }
 0x314   :  { %v780_v52 = vadd.f32 %v775_v32, %v770_v21  ;;  %v779_v53 = vadd.f32 %v775_v32, %v769_v22  ;;  %v777_v62 = vadd.f32 %v775_v32, %v767_v24  ;;  %v778_v35 = vadd.f32 %v775_v32, %v768_v33 }
 0x315   :  { %v781_v23 = vadd.f32 %v775_v32, %v771_v42 }
 0x316   :  { %v785_v47 = vmax.f32 %v780_v52, 0.0  ;;  %v784_v58 = vmax.f32 %v779_v53, 0.0  ;;  %v782_v1 = vmax.f32 %v777_v62, 0.0  ;;  %v783_v0 = vmax.f32 %v778_v35, 0.0 }
 0x317   :  { %v786_v25 = vmax.f32 %v781_v23, 0.0 }
 0x318   :  { %805 = vrot.lane.b32.xlu1 %v785_v47, %s1457_s20  ;;  %803 = vrot.lane.b32.xlu2 %v784_v58, %s1457_s20 }
 0x319   :  { %789 = vrot.lane.b32.xlu0 %v782_v1, %s1457_s20 }
 0x321   :  { %791 = vrot.lane.b32.xlu0 %v783_v0, %s1457_s20 }
 0x329   :  { %807 = vrot.lane.b32.xlu0 %v786_v25, %s1457_s20 }
 0x372   :  { %v804_v4 = vpop.permute.xlu2 %803 }
 0x38a   :  { %v806_v6 = vpop.permute.xlu1 %805 }
 0x38b   :  { %v1875_v9 = vsel %vm52_vm2, %v804_v4, %v806_v6  ;;  %v790_v29 = vpop.permute.xlu0 %789 }
 0x38c   :  { %797 = vst.msk [vmem:[#allocation2] sm:$0xff] %vm57_vm4, %v790_v29 }
 0x393   :  { %v792_v15 = vpop.permute.xlu0 %791  ;;  %v1080_v31 = vld [vmem:[#allocation2] sm:$0xff] }
 0x394   :  { %v1879_v44 = vsel %vm52_vm2, %v790_v29, %v792_v15  ;;  %799 = vst.msk [vmem:[#allocation2 + $0x10] sm:$0xff] %vm52_vm2, %v792_v15  ;;  %1090 = vrot.lane.b32.xlu1 %v1080_v31, %s1465_s11  ;;  %978 = vrot.lane.b32.xlu0 %v1080_v31, %s1469_s15  ;;  %v1046_v18 = vmul.f32 %v1080_v31, %v1588_v37 }
 0x395   :  { %814 = vst.msk [vmem:[#allocation2 + $0x10] sm:$0xff] %vm75_vm3, %v804_v4  ;;  %1092 = vrot.lane.b32.xlu2 %v1879_v44, %s1465_s11  ;;  %v822_v21 = vmul.f32 %v1080_v31, %v1728_v38  ;;  %v934_v22 = vmul.f32 %v1080_v31, %v1686_v12  ;;  %v1120_v37 = vmul.f32 %v1879_v44, %v1614_v49  ;;  %vm2147_vm3 = vcmask 588800  }
 0x396   :  { %v1047_v24 = vmul.f32 %v1879_v44, %v1649_v61  ;;  %v1049_v38 = vmul.f32 %v1875_v9, %v1634_v57  ;;  %v1122_v49 = vmul.f32 %v1875_v9, %v1619_v51  ;;  %v935_v61 = vmul.f32 %v1879_v44, %v1705_v19 }
 0x397   :  { %v1119_v32 = vmul.f32 %v1080_v31, %v1563_v27  ;;  %v1007_v52 = vmul.f32 %v1080_v31, %v1616_v50  ;;  %v1008_v27 = vmul.f32 %v1879_v44, %v1661_v2  ;;  %v895_v19 = vmul.f32 %v1080_v31, %v1682_v11 }
 0x398   :  { %v898_v50 = vmul.f32 %v1875_v9, %v1716_v26  ;;  %v937_v11 = vmul.f32 %v1875_v9, %v1692_v14 }
 0x39b   :  { %v808_v10 = vpop.permute.xlu0 %807 }
 0x39c   :  { %v810_v16 = vsel %vm52_vm2, %v806_v6, %v808_v10  ;;  %866 = vrot.lane.b32.xlu0 %v1080_v31, %s1472_s18  ;;  %v1890_v17 = vld [vmem:[#allocation2 + $0x10] sm:$0xff] }
 0x39d   :  { %816 = vst.msk [vmem:[#allocation2 + $0x20] sm:$0xff] %vm70_vm1, %v810_v16  ;;  %1094 = vrot.lane.b32.xlu1 %v1890_v17, %s1465_s11  ;;  %1096 = vrot.lane.b32.xlu2 %v1875_v9, %s1465_s11  ;;  %v1121_v12 = vmul.f32 %v1890_v17, %v1600_v43  ;;  %v1048_v43 = vmul.f32 %v1890_v17, %v1631_v56  ;;  %vm2145_vm1 = vcmask 990208  }
 0x39e   :  { %v897_v51 = vmul.f32 %v1890_v17, %v1669_v7  ;;  %v1009_v56 = vmul.f32 %v1890_v17, %v1595_v41  ;;  %v936_v2 = vmul.f32 %v1890_v17, %v1689_v13  ;;  %v823_v7 = vmul.f32 %v1879_v44, %v1771_v3  ;;  %vm2146_vm2 = vmmov %vm2145_vm1 }
 0x39f   :  { %v825_v13 = vmul.f32 %v1875_v9, %v1761_v59  ;;  %v824_v59 = vmul.f32 %v1890_v17, %v1758_v55  ;;  %vm2148_vm4 = vmmov %vm2145_vm1 }
 0x3a4   :  { %868 = vrot.lane.b32.xlu0 %v1879_v44, %s1472_s18  ;;  %v1904_v20 = vld [vmem:[#allocation2 + $0x20] sm:$0xff] }
 0x3a5   :  { %982 = vrot.lane.b32.xlu1 %v1890_v17, %s1469_s15  ;;  %980 = vrot.lane.b32.xlu2 %v1879_v44, %s1469_s15  ;;  %v1123_v57 = vmul.f32 %v1904_v20, %v1566_v28  ;;  %v1010_v28 = vmul.f32 %v1875_v9, %v1645_v60  ;;  %v896_v60 = vmul.f32 %v1879_v44, %v1733_v39 }
 0x3a6   :  { %v1011_v26 = vmul.f32 %v1904_v20, %v1674_v8  ;;  %v1050_v3 = vmul.f32 %v1904_v20, %v1603_v45  ;;  %v899_v53 = vmul.f32 %v1904_v20, %v1746_v48  ;;  %v938_v14 = vmul.f32 %v1904_v20, %v1719_v30 }
 0x3a7   :  { %v826_v62 = vmul.f32 %v1904_v20, %v1741_v46 }
 0x3ac   :  { %1056 = vrot.lane.b32.xlu0 %v1046_v18, %s1467_s13 }
 0x3ad   :  { %986 = vrot.lane.b32.xlu1 %v1904_v20, %s1469_s15  ;;  %984 = vrot.lane.b32.xlu2 %v1875_v9, %s1469_s15 }
 0x3b4   :  { %832 = vrot.lane.b32.xlu0 %v822_v21, %s1473_s19 }
 0x3b5   :  { %944 = vrot.lane.b32.xlu1 %v934_v22, %s1471_s17  ;;  %1098 = vrot.lane.b32.xlu2 %v1904_v20, %s1465_s11 }
 0x3bc   :  { %1131 = vrot.lane.b32.xlu0 %v1120_v37, %s1466_s12 }
 0x3bd   :  { %1058 = vrot.lane.b32.xlu1 %v1047_v24, %s1467_s13  ;;  %870 = vrot.lane.b32.xlu2 %v1890_v17, %s1472_s18 }
 0x3c4   :  { %1133 = vrot.lane.b32.xlu0 %v1121_v12, %s1466_s12 }
 0x3c5   :  { %1062 = vrot.lane.b32.xlu1 %v1049_v38, %s1467_s13  ;;  %872 = vrot.lane.b32.xlu2 %v1875_v9, %s1472_s18 }
 0x3cc   :  { %1135 = vrot.lane.b32.xlu0 %v1122_v49, %s1466_s12 }
 0x3cd   :  { %946 = vrot.lane.b32.xlu1 %v935_v61, %s1471_s17  ;;  %1129 = vrot.lane.b32.xlu2 %v1119_v32, %s1466_s12 }
 0x3d4   :  { %1060 = vrot.lane.b32.xlu0 %v1048_v43, %s1467_s13 }
 0x3d5   :  { %1137 = vrot.lane.b32.xlu1 %v1123_v57, %s1466_s12  ;;  %1017 = vrot.lane.b32.xlu2 %v1007_v52, %s1468_s14 }
 0x3dc   :  { %1019 = vrot.lane.b32.xlu0 %v1008_v27, %s1468_s14 }
 0x3dd   :  { %909 = vrot.lane.b32.xlu1 %v897_v51, %s1470_s16  ;;  %905 = vrot.lane.b32.xlu2 %v895_v19, %s1470_s16 }
 0x3e4   :  { %1023 = vrot.lane.b32.xlu0 %v1010_v28, %s1468_s14 }
 0x3e5   :  { %911 = vrot.lane.b32.xlu1 %v898_v50, %s1470_s16  ;;  %1021 = vrot.lane.b32.xlu2 %v1009_v56, %s1468_s14 }
 0x3ec   :  { %948 = vrot.lane.b32.xlu0 %v936_v2, %s1471_s17 }
 0x3ed   :  { %834 = vrot.lane.b32.xlu1 %v823_v7, %s1473_s19  ;;  %907 = vrot.lane.b32.xlu2 %v896_v60, %s1470_s16 }
 0x3ef   :  { %v1093_v41 = vpop.permute.xlu2 %1092 }
 0x3f4   :  { %950 = vrot.lane.b32.xlu0 %v937_v11, %s1471_s17 }
 0x3f5   :  { %1025 = vrot.lane.b32.xlu1 %v1011_v26, %s1468_s14  ;;  %838 = vrot.lane.b32.xlu2 %v825_v13, %s1473_s19 }
 0x3f7   :  { %v1097_v39 = vpop.permute.xlu2 %1096 }
 0x3fc   :  { %1064 = vrot.lane.b32.xlu0 %v1050_v3, %s1467_s13 }
 0x3fd   :  { %913 = vrot.lane.b32.xlu1 %v899_v53, %s1470_s16  ;;  %952 = vrot.lane.b32.xlu2 %v938_v14, %s1471_s17 }
 0x3ff   :  { %v981_v8 = vpop.permute.xlu2 %980 }
 0x404   :  { %836 = vrot.lane.b32.xlu0 %v824_v59, %s1473_s19 }
 0x405   :  { %840 = vrot.lane.b32.xlu2 %v826_v62, %s1473_s19 }
 0x406   :  { %v1091_v45 = vpop.permute.xlu1 %1090  ;;  %v979_v48 = vpop.permute.xlu0 %978 }
 0x407   :  { %v1100_v30 = vsel %vm482_vm13, %v1091_v45, %v1093_v41  ;;  %v2000_v47 = vsel %vm327_vm0, %v979_v48, %v981_v8  ;;  %v985_v58 = vpop.permute.xlu2 %984 }
 0x40c   :  { %874 = vrot.lane.b32.xlu0 %v1904_v20, %s1472_s18 }
 0x40e   :  { %v867_v1 = vpop.permute.xlu0 %866 }
 0x40f   :  { %v1095_v55 = vpop.permute.xlu1 %1094  ;;  %v1099_v33 = vpop.permute.xlu2 %1098 }
 0x410   :  { %v1101_v46 = vsel %vm482_vm13, %v1093_v41, %v1095_v55  ;;  %v1102_v35 = vsel %vm482_vm13, %v1095_v55, %v1097_v39  ;;  %v1103_v0 = vsel %vm482_vm13, %v1097_v39, %v1099_v33  ;;  %1113 = vst.msk [vmem:[#allocation3 + $0x138] sm:$0xff] %vm144_vm11, %v1099_v33  ;;  %v1153_v33 = vld [vmem:[%s2139_s4] sm:$0xff]  ;;  %vm2150_vm13 = vmmov %vm2147_vm3 }
 0x416   :  { %v869_v42 = vpop.permute.xlu0 %868 }
 0x417   :  { %v2009_v23 = vsel %vm166_vm7, %v867_v1, %v869_v42  ;;  %v983_v25 = vpop.permute.xlu1 %982  ;;  %v871_v4 = vpop.permute.xlu2 %870 }
 0x418   :  { %v989_v6 = vsel %vm327_vm0, %v981_v8, %v983_v25  ;;  %v2013_v9 = vsel %vm327_vm0, %v983_v25, %v985_v58  ;;  %v2016_v29 = vsel %vm166_vm7, %v869_v42, %v871_v4 }
 0x41e   :  { %v1057_v15 = vpop.permute.xlu0 %1056 }
 0x41f   :  { %v987_v44 = vpop.permute.xlu1 %986  ;;  %v2018_v31 = vpop.permute.xlu2 %872 }
 0x420   :  { %v2021_v10 = vsel %vm327_vm0, %v985_v58, %v987_v44  ;;  %1001 = vst.msk [vmem:[#allocation3 + $0xc0] sm:$0xff] %vm144_vm11, %v987_v44  ;;  %v2026_v16 = vsel %vm166_vm7, %v871_v4, %v2018_v31  ;;  %vm2153_vm0 = vmmov %vm2147_vm3 }
 0x426   :  { %v2028_v17 = vpop.permute.xlu0 %832 }
 0x427   :  { %v945_v18 = vpop.permute.xlu1 %944  ;;  %v1130_v20 = vpop.permute.xlu2 %1129 }
 0x42e   :  { %v1132_v21 = vpop.permute.xlu0 %1131 }
 0x42f   :  { %v1139_v22 = vsel %vm542_vm12, %v1130_v20, %v1132_v21  ;;  %v1059_v37 = vpop.permute.xlu1 %1058  ;;  %v1018_v24 = vpop.permute.xlu2 %1017  ;;  %v1178_v20 = vld [vmem:[#allocation3 + $0xc0] sm:$0xff] }
 0x430   :  { %v1066_v12 = vsel %vm447_vm14, %v1057_v15, %v1059_v37  ;;  %1209 = vmatpush.msrb.mxu1 %v1139_v22 }
 0x432   :  { %1210 = vmatpush.msrb.mxu1 %v1100_v30 }
 0x434   :  { %1211 = vmatpush.msrb.mxu1 %v1066_v12 }
 0x436   :  { %v1134_v38 = vpop.permute.xlu0 %1133 }
 0x437   :  { %v1140_v49 = vsel %vm542_vm12, %v1132_v21, %v1134_v38  ;;  %v2033_v61 = vpop.permute.xlu1 %1062  ;;  %v906_v32 = vpop.permute.xlu2 %905 }
 0x438   :  { %1229 = vmatpush.msrb.mxu2 %v1140_v49 }
 0x43a   :  { %1230 = vmatpush.msrb.mxu2 %v1101_v46  ;;  %v1193_v46 = vld [vmem:[#allocation3 + $0x138] sm:$0xff] }
 0x43e   :  { %v1136_v43 = vpop.permute.xlu0 %1135 }
 0x43f   :  { %v1141_v57 = vsel %vm542_vm12, %v1134_v38, %v1136_v43  ;;  %v947_v52 = vpop.permute.xlu1 %946  ;;  %v1022_v27 = vpop.permute.xlu2 %1021 }
 0x440   :  { %v954_v51 = vsel %vm292_vm5, %v945_v18, %v947_v52  ;;  %1249 = vmatpush.msrb.mxu3 %v1141_v57 }
 0x442   :  { %1250 = vmatpush.msrb.mxu3 %v1102_v35 }
 0x446   :  { %v1061_v19 = vpop.permute.xlu0 %1060 }
 0x447   :  { %v1067_v28 = vsel %vm447_vm14, %v1059_v37, %v1061_v19  ;;  %v1068_v50 = vsel %vm447_vm14, %v1061_v19, %v2033_v61  ;;  %v1138_v56 = vpop.permute.xlu1 %1137  ;;  %v908_v2 = vpop.permute.xlu2 %907 }
 0x448   :  { %v1142_v7 = vsel %vm542_vm12, %v1136_v43, %v1138_v56  ;;  %1231 = vmatpush.msrb.mxu2 %v1067_v28  ;;  %1251 = vmatpush.msrb.mxu3 %v1068_v50  ;;  %v915_v60 = vsel %vm232_vm6, %v906_v32, %v908_v2  ;;  %1152 = vst.msk [vmem:[#allocation3 + $0x160] sm:$0xff] %vm144_vm11, %v1138_v56  ;;  %vm2149_vm12 = vmmov %vm2145_vm1 }
 0x449   :  { %1269 = vmatpush.msra.mxu0 %v1142_v7 }
 0x44b   :  { %1270 = vmatpush.msra.mxu0 %v1103_v0 }
 0x44e   :  { %v1020_v41 = vpop.permute.xlu0 %1019 }
 0x44f   :  { %v1027_v11 = vsel %vm387_vm15, %v1018_v24, %v1020_v41  ;;  %v1028_v26 = vsel %vm387_vm15, %v1020_v41, %v1022_v27  ;;  %v910_v13 = vpop.permute.xlu1 %909  ;;  %v839_v39 = vpop.permute.xlu2 %838  ;;  %v1198_v55 = vld [vmem:[#allocation3 + $0x160] sm:$0xff] }
 0x450   :  { %v916_v3 = vsel %vm232_vm6, %v908_v2, %v910_v13  ;;  %1212 = vmatpush.msrb.mxu1 %v1027_v11  ;;  %1232 = vmatpush.msrb.mxu2 %v1028_v26 }
 0x452   :  { %1213 = vmatpush.msrb.mxu1 %v2000_v47  ;;  %1233 = vmatpush.msrb.mxu2 %v989_v6 }
 0x454   :  { %1214 = vmatpush.msrb.mxu1 %v954_v51 }
 0x456   :  { %v1024_v53 = vpop.permute.xlu0 %1023  ;;  %1215 = vmatpush.msrb.mxu1 %v915_v60 }
 0x457   :  { %v1029_v14 = vsel %vm387_vm15, %v1022_v27, %v1024_v53  ;;  %v912_v8 = vpop.permute.xlu1 %911  ;;  %v953_v59 = vpop.permute.xlu2 %952 }
 0x458   :  { %v917_v62 = vsel %vm232_vm6, %v910_v13, %v912_v8  ;;  %1216 = vmatpush.msrb.mxu1 %v2009_v23  ;;  %1252 = vmatpush.msrb.mxu3 %v1029_v14  ;;  %967 = vst.msk [vmem:[#allocation3 + $0x98] sm:$0xff] %vm144_vm11, %v953_v59 }
 0x45a   :  { %1253 = vmatpush.msrb.mxu3 %v2013_v9 }
 0x45e   :  { %v949_v45 = vpop.permute.xlu0 %948 }
 0x45f   :  { %v955_v48 = vsel %vm292_vm5, %v947_v52, %v949_v45  ;;  %v835_v30 = vpop.permute.xlu1 %834  ;;  %v841_v47 = vpop.permute.xlu2 %840 }
 0x460   :  { %v842_v58 = vsel %vm2145_vm1, %v2028_v17, %v835_v30  ;;  %v845_v1 = vsel %vm2146_vm2, %v839_v39, %v841_v47  ;;  %1234 = vmatpush.msrb.mxu2 %v955_v48  ;;  %855 = vst.msk [vmem:[#allocation3 + $0x20] sm:$0xff] %vm144_vm11, %v841_v47 }
 0x461   :  { %1217 = vmatpush.msrb.mxu1 %v842_v58  ;;  %v1330_v58 = vld [vmem:[%s2140_s5] sm:$0xff] }
 0x462   :  { %1235 = vmatpush.msrb.mxu2 %v916_v3  ;;  %1420 = vmatmul.msk.f32.vlgmr.msrb.gmra.mxu1 %vm2147_vm3, %v1153_v33 }
 0x463   :  { %1289 = vmatpush.msra.mxu1 %v1198_v55 }
 0x464   :  { %1236 = vmatpush.msrb.mxu2 %v2016_v29 }
 0x465   :  { %1290 = vmatpush.msra.mxu1 %v1193_v46 }
 0x466   :  { %v951_v35 = vpop.permute.xlu0 %950 }
 0x467   :  { %v956_v0 = vsel %vm292_vm5, %v949_v45, %v951_v35  ;;  %v957_v42 = vsel %vm292_vm5, %v951_v35, %v953_v59  ;;  %v1026_v23 = vpop.permute.xlu1 %1025  ;;  %v1158_v12 = vld [vmem:[#allocation3 + $0x20] sm:$0xff]  ;;  %v1343_v35 = vld [vmem:[%s2141_s6] sm:$0xff]  ;;  %s1476_s6 = smov 112  }
 0x468   :  { %v1030_v25 = vsel %vm387_vm15, %v1024_v53, %v1026_v23  ;;  %1254 = vmatpush.msrb.mxu3 %v956_v0  ;;  %1040 = vst.msk [vmem:[#allocation3 + $0xe8] sm:$0xff] %vm144_vm11, %v1026_v23  ;;  %vm2152_vm15 = vmmov %vm2147_vm3 }
 0x46a   :  { %1255 = vmatpush.msrb.mxu3 %v917_v62 }
 0x46c   :  { %1256 = vmatpush.msrb.mxu3 %v2026_v16 }
 0x46e   :  { %v1065_v4 = vpop.permute.xlu0 %1064 }
 0x46f   :  { %v1069_v6 = vsel %vm447_vm14, %v2033_v61, %v1065_v4  ;;  %1079 = vst.msk [vmem:[#allocation3 + $0x110] sm:$0xff] %vm144_vm11, %v1065_v4  ;;  %v914_v9 = vpop.permute.xlu1 %913  ;;  %v1183_v18 = vld [vmem:[#allocation3 + $0xe8] sm:$0xff]  ;;  %vm2151_vm14 = vmmov %vm2147_vm3 }
 0x470   :  { %v918_v29 = vsel %vm232_vm6, %v912_v8, %v914_v9  ;;  %1271 = vmatpush.msra.mxu0 %v1069_v6  ;;  %928 = vst.msk [vmem:[#allocation3 + $0x70] sm:$0xff] %vm144_vm11, %v914_v9 }
 0x472   :  { %1272 = vmatpush.msra.mxu0 %v1030_v25 }
 0x474   :  { %1273 = vmatpush.msra.mxu0 %v2021_v10  ;;  %v1173_v10 = vld [vmem:[#allocation3 + $0x98] sm:$0xff] }
 0x476   :  { %v837_v15 = vpop.permute.xlu0 %836  ;;  %v1188_v44 = vld [vmem:[#allocation3 + $0x110] sm:$0xff]  ;;  %1274 = vmatpush.msra.mxu0 %v957_v42 }
 0x477   :  { %v843_v16 = vsel %vm2148_vm4, %v835_v30, %v837_v15  ;;  %v844_v17 = vsel %vm2149_vm12, %v837_v15, %v839_v39  ;;  %1291 = vmatpush.msra.mxu1 %v1188_v44  ;;  %v1168_v22 = vld [vmem:[#allocation3 + $0x70] sm:$0xff]  ;;  %v1367_v15 = vld [vmem:[%s2132_s0 + $0x8] sm:$0xff] }
 0x478   :  { %1237 = vmatpush.msrb.mxu2 %v843_v16  ;;  %1257 = vmatpush.msrb.mxu3 %v844_v17  ;;  %v1426_v42 = vld [vmem:[%s2132_s0 + $0x18] sm:$0xff] }
 0x479   :  { %1292 = vmatpush.msra.mxu1 %v1183_v18  ;;  %1275 = vmatpush.msra.mxu0 %v918_v29  ;;  %v1366_v29 = vld [vmem:[%s2132_s0] sm:$0xff] }
 0x47a   :  { %1421 = vmatmul.msk.f32.vlgmr.msrb.gmra.mxu2 %vm2150_vm13, %v1153_v33  ;;  %1422 = vmatmul.msk.f32.vlgmr.msrb.gmra.mxu3 %vm2151_vm14, %v1153_v33 }
 0x47b   :  { %1293 = vmatpush.msra.mxu1 %v1178_v20 }
 0x47d   :  { %1294 = vmatpush.msra.mxu1 %v1173_v10 }
 0x47e   :  { %v875_v21 = vpop.permute.xlu0 %874 }
 0x47f   :  { %v879_v37 = vsel %vm166_vm7, %v2018_v31, %v875_v21  ;;  %889 = vst.msk [vmem:[#allocation3 + $0x48] sm:$0xff] %vm144_vm11, %v875_v21  ;;  %1295 = vmatpush.msra.mxu1 %v1168_v22 }
 0x480   :  { %1276 = vmatpush.msra.mxu0 %v879_v37 }
 0x482   :  { %1277 = vmatpush.msra.mxu0 %v845_v1 }
 0x483   :  { %1423 = vmatmul.msk.f32.vlgmr.msra.gmra.mxu0 %vm2152_vm15, %v1153_v33 }
 0x486   :  { %v1163_v24 = vld [vmem:[#allocation3 + $0x48] sm:$0xff] }
 0x487   :  { %1296 = vmatpush.msra.mxu1 %v1163_v24 }
 0x489   :  { %1297 = vmatpush.msra.mxu1 %v1158_v12 }
 0x48a   :  { %1424 = vmatmul.msk.f32.vlgmr.msra.gmra.mxu1 %vm2153_vm0, %v1153_v33 }
 0x4df   :  { %v1219_v38 = vpop.f32.mrf.mxu1 }
 0x4e0   :  { %v1302_v49 = vmul.f32 %v1219_v38, %v708_v36 }
 0x4e2   :  { %v1314_v43 = vmul.f32 %v1302_v49, %v1219_v38 }
 0x4fd   :  { %v1239_v61 = vpop.f32.mrf.mxu2  ;;  %v1259_v32 = vpop.f32.mrf.mxu3 }
 0x4fe   :  { %v1303_v31 = vmul.f32 %v1239_v61, %v709_v40  ;;  %v1304_v57 = vmul.f32 %v1259_v32, %v710_v54 }
 0x500   :  { %v1315_v52 = vmul.f32 %v1303_v31, %v1239_v61  ;;  %v2088_v27 = vpop.f32.mrf.mxu0  ;;  %v1307_v51 = vadd.f32 %v1303_v31, %v1302_v49  ;;  %v1316_v28 = vmul.f32 %v1304_v57, %v1259_v32 }
 0x501   :  { %v1305_v50 = vmul.f32 %v2088_v27, %v711_v63  ;;  %v1425_v63 = vld [vmem:[%s2132_s0 + $0x10] sm:$0xff] }
 0x502   :  { %v1319_v19 = vadd.f32 %v1315_v52, %v1314_v43  ;;  %v1308_v36 = vadd.f32 %v1307_v51, %v1304_v57  ;;  %1378 = vrot.lane.b32.xlu2 %v1425_v63, %s1475_s26 }
 0x503   :  { %v1317_v7 = vmul.f32 %v1305_v50, %v2088_v27 }
 0x504   :  { %v1320_v56 = vadd.f32 %v1319_v19, %v1316_v28  ;;  %v1309_v60 = vadd.f32 %v1308_v36, %v1305_v50 }
 0x506   :  { %v1321_v26 = vadd.f32 %v1320_v56, %v1317_v7 }
 0x507   :  { %v1299_v2 = vpop.f32.mrf.mxu1 }
 0x508   :  { %v1306_v40 = vmul.f32 %v1299_v2, %v712_v5 }
 0x50a   :  { %v1318_v54 = vmul.f32 %v1306_v40, %v1299_v2  ;;  %v1310_v41 = vsel %vm144_vm11, %v1306_v40, 0.0 }
 0x50b   :  { %v1311_v11 = vadd.f32 %v1310_v41, %v1309_v60 }
 0x50c   :  { %v1322_v13 = vsel %vm144_vm11, %v1318_v54, 0.0 }
 0x50d   :  { %1312 = vadd.xlane.f32.xlu1 %v1311_v11  ;;  %v1323_v39 = vadd.f32 %v1322_v13, %v1321_v26 }
 0x50f   :  { %1324 = vadd.xlane.f32.xlu0 %v1323_v39 }
 0x55c   :  { %v1379_v23 = vpop.permute.xlu2 %1378 }
 0x580   :  { %v1313_v34 = vpop.xlane.xlu1 %1312 }
 0x581   :  { %v1326_v5 = vmul.f32 0.001953125, %v1313_v34 }
 0x582   :  { %v1325_v3 = vpop.xlane.xlu0 %1324 }
 0x583   :  { %v1328_v53 = vmul.f32 %v1326_v5, %v1326_v5  ;;  %v1327_v14 = vmul.f32 0.001953125, %v1325_v3 }
 0x585   :  { %v1329_v8 = vsub.f32 %v1327_v14, %v1328_v53 }
 0x587   :  { %v1331_v59 = vadd.f32 1e-05, %v1329_v8 }
 0x589   :  { %1454 = vrsqrt.f32 %v1331_v59  ;;  %vm1338_vm6 = vweird.f32 %v1331_v59 }
 0x58f   :  { %v1455_v62 = vpop.eup %1454 }
 0x590   :  { %v1333_v45 = vmul.f32 %v1455_v62, %v1331_v59  ;;  %vm1339_vm5 = vweird.f32 %v1455_v62 }
 0x591   :  { %vm1340_vm7 = vmor %vm1338_vm6, %vm1339_vm5 }
 0x592   :  { %v1334_v48 = vmul.f32 %v1455_v62, %v1333_v45 }
 0x594   :  { %v1335_v30 = vmul.f32 0.5, %v1334_v48 }
 0x596   :  { %v1336_v47 = vsub.f32 1.5, %v1335_v30 }
 0x598   :  { %v1337_v1 = vmul.f32 %v1455_v62, %v1336_v47 }
 0x59a   :  { %v1341_v55 = vsel %vm1340_vm7, %v1455_v62, %v1337_v1 }
 0x59b   :  { %v1342_v33 = vmul.f32 %v1341_v55, %v1330_v58 }
 0x59d   :  { %1348 = vperm.xlu2 %1451, %v1342_v33   ;;  %v1344_v46 = vmul.f32 %v1342_v33, %v1326_v5 }
 0x59f   :  { %v1345_v0 = vsub.f32 %v1343_v35, %v1344_v46 }
 0x5a5   :  { %1358 = vperm.xlu2 %1451, %v1345_v0  }
 0x5ad   :  { %1380 = vrot.lane.b32.xlu2 %v1426_v42, %s1475_s26 }
 0x5f7   :  { %v1349_v25 = vpop.permute.xlu2 %1348 }
 0x5f8   :  { %v1351_v4 = vmul.f32 %v1349_v25, %v1219_v38  ;;  %v1352_v6 = vmul.f32 %v1349_v25, %v1239_v61  ;;  %v1353_v9 = vmul.f32 %v1349_v25, %v1259_v32  ;;  %v1355_v12 = vmul.f32 %v1349_v25, %v1299_v2 }
 0x5f9   :  { %v1354_v38 = vmul.f32 %v1349_v25, %v2088_v27 }
 0x5ff   :  { %v1359_v44 = vpop.permute.xlu2 %1358 }
 0x600   :  { %v1361_v16 = vadd.f32 %v1359_v44, %v1351_v4  ;;  %v1362_v17 = vadd.f32 %v1359_v44, %v1352_v6  ;;  %v1363_v18 = vadd.f32 %v1359_v44, %v1353_v9  ;;  %v1365_v49 = vadd.f32 %v1359_v44, %v1355_v12 }
 0x601   :  { %v1364_v61 = vadd.f32 %v1359_v44, %v1354_v38 }
 0x602   :  { %v1368_v20 = vadd.f32 %v1366_v29, %v1361_v16  ;;  %v1369_v10 = vadd.f32 %v1367_v15, %v1362_v17  ;;  %v1386_v21 = vadd.f32 %v1379_v23, %v1363_v18 }
 0x604   :  { %v1370_v22 = vmax.f32 %v1368_v20, 0.0  ;;  %v1371_v37 = vmax.f32 %v1369_v10, 0.0  ;;  %v1389_v24 = vmax.f32 %v1386_v21, 0.0 }
 0x606   :  { %1395 = vrot.lane.b32.xlu2 %v1389_v24, %s1476_s6  ;;  %1372 = vst [vmem:[%s2142_s10] sm:$0xff] %v1370_v22 }
 0x607   :  { %v1381_v32 = vpop.permute.xlu2 %1380  ;;  %1373 = vst [vmem:[%s2142_s10 + $0x8] sm:$0xff] %v1371_v37 }
 0x608   :  { %v1382_v31 = vsel %vm144_vm11, %v1379_v23, %v1381_v32  ;;  %v1388_v43 = vadd.f32 %v1381_v32, %v1365_v49 }
 0x609   :  { %v1387_v57 = vadd.f32 %v1382_v31, %v1364_v61 }
 0x60a   :  { %v1391_v51 = vmax.f32 %v1388_v43, 0.0 }
 0x60b   :  { %v1390_v52 = vmax.f32 %v1387_v57, 0.0 }
 0x60d   :  { %1397 = vrot.lane.b32.xlu1 %v1390_v52, %s1476_s6 }
 0x60e   :  { %1399 = vrot.lane.b32.xlu2 %v1391_v51, %s1476_s6 }
 0x660   :  { %v1396_v27 = vpop.permute.xlu2 %1395 }
 0x668   :  { %v1400_v19 = vpop.permute.xlu2 %1399 }
 0x67f   :  { %v1398_v28 = vpop.permute.xlu1 %1397 }
 0x680   :  { %v1402_v50 = vsel %vm1401_vm8, %v1396_v27, %v1398_v28  ;;  %v1403_v36 = vsel %vm1401_vm8, %v1398_v28, %v1400_v19 }
 0x681   :  { %1427 = vst [vmem:[%s2142_s10 + $0x10] sm:$0xff] %v1402_v50 }
 0x682   :  { %1428 = vst [vmem:[%s2142_s10 + $0x18] sm:$0xff] %v1403_v36 }

</bundles_post_ra>
